<compile_context>
chip_gen: v5e
topology: v5e:2x2
jax: 0.10.0
libtpu: 0.0.40
codegen_flags: <defaults>
</compile_context>

<pallas_src>
import functools

import jax
import jax.numpy as jnp
from jax import lax
from jax.experimental import pallas as pl
from jax.experimental.pallas import tpu as pltpu

H = 32                     # hidden width
CHUNK = 256                # lanes per independent sub-chain
NCHAINS = 4                # independent sub-chains in flight per inner step
GROUP = CHUNK * NCHAINS    # lanes consumed per inner-loop iteration (1024)


def _mlp_kernel(x_ref, w1_ref, wmid_ref, w5_ref, b_ref, o_ref, *, use_bf16_tanh):
    # x_ref:    (2, TM)      input coords, batch on the 128-lane axis
    # w1_ref:   (32, 2)      layer-1 weight (out, in)
    # wmid_ref: (3, 32, 32)  layer-2..4 weights stacked (out, in)
    # w5_ref:   (32, 1)      layer-5 weight stored as a column
    # b_ref:    (32, 8)      column j = bias of layer j+1 (layer-5 bias at [0, 4])
    # o_ref:    (1, TM)      output, batch on lanes
    tm = x_ref.shape[1]

    # ---- hoisted once per grid step (grid-invariant weights / biases) ----
    w1 = w1_ref[...]
    w1c0 = w1[:, 0:1]                          # (32, 1)
    w1c1 = w1[:, 1:2]                          # (32, 1)
    w2 = wmid_ref[0]                           # (32, 32)
    w3 = wmid_ref[1]
    w4 = wmid_ref[2]
    w5c = w5_ref[...]                          # (32, 1)
    b = b_ref[...]
    # Bias broadcasts hoisted to chunk width (JAX does not CSE broadcast_in_dim).
    b1b = jnp.broadcast_to(b[:, 0:1], (H, CHUNK))
    b2b = jnp.broadcast_to(b[:, 1:2], (H, CHUNK))
    b3b = jnp.broadcast_to(b[:, 2:3], (H, CHUNK))
    b4b = jnp.broadcast_to(b[:, 3:4], (H, CHUNK))
    b5 = b[0:1, 4:5]                           # (1, 1)

    def act(z):
        if use_bf16_tanh:
            # v6e/v7x only: bf16 EUP tanh ~2x throughput; matmuls stay f32.
            return jnp.tanh(z.astype(jnp.bfloat16)).astype(jnp.float32)
        return jnp.tanh(z)

    def chain(off):
        # Layer 1 (K=2): VPU broadcast mul/add — no MXU round trip.
        x0 = x_ref[0:1, pl.ds(off, CHUNK)].astype(jnp.float32)    # (1, CHUNK)
        x1 = x_ref[1:2, pl.ds(off, CHUNK)].astype(jnp.float32)
        h = act(w1c0 * x0 + w1c1 * x1 + b1b)                      # (32, CHUNK)
        # Layers 2-4: 32x32 MXU matmuls, f32 accumulation.
        h = act(jnp.dot(w2, h, preferred_element_type=jnp.float32) + b2b)
        h = act(jnp.dot(w3, h, preferred_element_type=jnp.float32) + b3b)
        h = act(jnp.dot(w4, h, preferred_element_type=jnp.float32) + b4b)
        # Layer 5 (1 output row): VPU multiply + XLU cross-sublane reduce.
        y = jnp.sum(h * w5c, axis=0, keepdims=True) + b5          # (1, CHUNK)
        o_ref[:, pl.ds(off, CHUNK)] = y.astype(o_ref.dtype)

    num_groups = tm // GROUP

    def group_body(g, carry):
        base = pl.multiple_of(g * GROUP, GROUP)
        # NCHAINS independent chains in one basic block: scheduler overlaps one
        # chain's MXU work with another's EUP tanh / VPU / XLU work.
        for c in range(NCHAINS):
            chain(pl.multiple_of(base + c * CHUNK, CHUNK))
        return carry

    lax.fori_loop(0, num_groups, group_body, 0, unroll=(num_groups <= 8))


def _pack_params(params):
    """params: list of (W (out,in), b (out,)) torch-style. Pack for the kernel."""
    ws = [w for (w, _) in params]
    bs = [b for (_, b) in params]
    w1 = jnp.asarray(ws[0], jnp.float32)                               # (32, 2)
    wmid = jnp.stack([jnp.asarray(w, jnp.float32) for w in ws[1:4]])   # (3, 32, 32)
    w5 = jnp.asarray(ws[4], jnp.float32).reshape(H, 1)                 # (32, 1)
    bpk = jnp.zeros((H, 8), jnp.float32)
    for j in range(4):
        bpk = bpk.at[:, j].set(jnp.asarray(bs[j], jnp.float32))
    bpk = bpk.at[0, 4].set(jnp.asarray(bs[4], jnp.float32)[0])
    return w1, wmid, w5, bpk


def _pick_tile(n, tile_m):
    """Tile: multiple of GROUP; clamp so grid >= 2 when possible (v7x: 2 TCs)."""
    cap = GROUP * max(1, pl.cdiv(n, 2 * GROUP))
    tm = min(max(tile_m, GROUP), cap)
    return (tm // GROUP) * GROUP


def mlp_forward_fm(xt, params, *, tile_m=4096, use_bf16_tanh=False):
    """Feature-major entry point. xt: (2, N) -> (1, N) float32.

    In a training loop keep collocation points in this (2, N) layout (ideally
    pre-padded to a GROUP multiple) to avoid the per-call transpose/pad copy.
    """
    d_in, n = xt.shape
    assert d_in == 2
    w1, wmid, w5, bpk = _pack_params(params)

    tm = _pick_tile(n, tile_m)
    grid = pl.cdiv(n, tm)
    n_pad = grid * tm
    if n_pad != n:
        xt = jnp.pad(xt, ((0, 0), (0, n_pad - n)))   # finite zero tail, sliced off

    # per point: 2*(2*32 + 3*32*32 + 32*1) = 6336 flops, 4*32 = 128 tanh
    weight_bytes = 4 * (H * 2 + 3 * H * H + H + H * 8)
    cost = pl.CostEstimate(
        flops=6336 * n_pad,
        transcendentals=128 * n_pad,
        bytes_accessed=12 * n_pad + weight_bytes,
    )

    kernel = functools.partial(_mlp_kernel, use_bf16_tanh=use_bf16_tanh)
    out = pl.pallas_call(
        kernel,
        out_shape=jax.ShapeDtypeStruct((1, n_pad), jnp.float32),
        grid_spec=pltpu.PrefetchScalarGridSpec(
            num_scalar_prefetch=0,
            grid=(grid,),
            in_specs=[
                pl.BlockSpec((2, tm), lambda i: (0, i)),        # x (batch on lanes)
                pl.BlockSpec((H, 2), lambda i: (0, 0)),         # W1
                pl.BlockSpec((3, H, H), lambda i: (0, 0, 0)),   # W2..W4 stacked
                pl.BlockSpec((H, 1), lambda i: (0, 0)),         # W5 column
                pl.BlockSpec((H, 8), lambda i: (0, 0)),         # packed biases
            ],
            out_specs=pl.BlockSpec((1, tm), lambda i: (0, i)),
        ),
        compiler_params=pltpu.CompilerParams(
            dimension_semantics=("parallel",)),
        cost_estimate=cost,
    )(xt, w1, wmid, w5, bpk)
    return out[:, :n]


def mlp_forward(x, params, *, tile_m=4096, use_bf16_tanh=False):
    """Drop-in forward matching the torch module: x (N, 2) -> (N, 1) float32."""
    n, d_in = x.shape
    assert d_in == 2
    # TODO(synk): in a real PINN loop, produce x feature-major (2, N) pre-padded
    # and call mlp_forward_fm directly to skip this transpose+pad HBM copy.
    out = mlp_forward_fm(x.T, params, tile_m=tile_m, use_bf16_tanh=use_bf16_tanh)
    return out[0].reshape(n, 1)


def init_params(key):
    """Deterministic init mimicking torch.nn.Linear (uniform +-1/sqrt(fan_in)).

    Weights stored torch-style as (out_features, in_features)."""
    sizes = [(2, 32), (32, 32), (32, 32), (32, 32), (32, 1)]
    params = []
    for fan_in, fan_out in sizes:
        key, kw, kb = jax.random.split(key, 3)
        bound = 1.0 / (fan_in ** 0.5)
        w = jax.random.uniform(kw, (fan_out, fan_in), jnp.float32, -bound, bound)
        b = jax.random.uniform(kb, (fan_out,), jnp.float32, -bound, bound)
        params.append((w, b))
    return params


def mlp_ref(x, params):
    h = x
    for i, (w, b) in enumerate(params):
        h = h @ w.T + b
        if i < len(params) - 1:
            h = jnp.tanh(h)
    return h


if __name__ == "__main__":
    key = jax.random.PRNGKey(0)
    kx, kp = jax.random.split(key)

    N = 1000  # batch of collocation points (x, t) — ragged vs tile on purpose
    x = jax.random.normal(kx, (N, 2), jnp.float32)
    params = init_params(kp)

    y = mlp_forward(x, params)
    y = jax.block_until_ready(y)

    y_ref = mlp_ref(x, params)
    assert y.shape == (N, 1)
    assert jnp.allclose(y, y_ref, atol=1e-5, rtol=1e-5), "mismatch vs JAX reference"

    print("KERNEL_OK")
</pallas_src>

<mosaic_0001>
module attributes {stable_mosaic.version = 11 : i64} {
  func.func @_mlp_kernel(%arg0: i32, %arg1: memref<2x1024xf32, #tpu.memory_space<vmem>>, %arg2: memref<32x2xf32, #tpu.memory_space<vmem>>, %arg3: memref<3x32x32xf32, #tpu.memory_space<vmem>>, %arg4: memref<32x1xf32, #tpu.memory_space<vmem>>, %arg5: memref<32x8xf32, #tpu.memory_space<vmem>>, %arg6: memref<1x1024xf32, #tpu.memory_space<vmem>>) attributes {dimension_semantics = [#tpu.dimension_semantics<parallel>], iteration_bounds = array<i64: 1>, scalar_prefetch = 0 : i64, scratch_operands = 0 : i64, tpu.core_type = #tpu.core_type<tc>, window_params = [{transform_indices = @transform_0, window_bounds = array<i64: 2, 1024>}, {pipeline_mode = #tpu.pipeline_mode<synchronous>, transform_indices = @transform_1, window_bounds = array<i64: 32, 2>}, {pipeline_mode = #tpu.pipeline_mode<synchronous>, transform_indices = @transform_2, window_bounds = array<i64: 3, 32, 32>}, {pipeline_mode = #tpu.pipeline_mode<synchronous>, transform_indices = @transform_3, window_bounds = array<i64: 32, 1>}, {pipeline_mode = #tpu.pipeline_mode<synchronous>, transform_indices = @transform_4, window_bounds = array<i64: 32, 8>}, {transform_indices = @transform_5, window_bounds = array<i64: 1, 1024>}]} {
    %c0 = arith.constant 0 : index
    %c0_0 = arith.constant 0 : index
    %0 = vector.load %arg2[%c0, %c0_0] : memref<32x2xf32, #tpu.memory_space<vmem>>, vector<32x2xf32>
    %1 = vector.extract_strided_slice %0 {offsets = [0, 0], sizes = [32, 1], strides = [1, 1]} : vector<32x2xf32> to vector<32x1xf32>
    %2 = vector.extract_strided_slice %0 {offsets = [0, 1], sizes = [32, 1], strides = [1, 1]} : vector<32x2xf32> to vector<32x1xf32>
    %c0_1 = arith.constant 0 : index
    %c0_2 = arith.constant 0 : index
    %c0_3 = arith.constant 0 : index
    %3 = vector.load %arg3[%c0_1, %c0_2, %c0_3] : memref<3x32x32xf32, #tpu.memory_space<vmem>>, vector<1x32x32xf32>
    %4 = vector.shape_cast %3 : vector<1x32x32xf32> to vector<32x32xf32>
    %c1 = arith.constant 1 : index
    %c0_4 = arith.constant 0 : index
    %c0_5 = arith.constant 0 : index
    %5 = vector.load %arg3[%c1, %c0_4, %c0_5] : memref<3x32x32xf32, #tpu.memory_space<vmem>>, vector<1x32x32xf32>
    %6 = vector.shape_cast %5 : vector<1x32x32xf32> to vector<32x32xf32>
    %c2 = arith.constant 2 : index
    %c0_6 = arith.constant 0 : index
    %c0_7 = arith.constant 0 : index
    %7 = vector.load %arg3[%c2, %c0_6, %c0_7] : memref<3x32x32xf32, #tpu.memory_space<vmem>>, vector<1x32x32xf32>
    %8 = vector.shape_cast %7 : vector<1x32x32xf32> to vector<32x32xf32>
    %c0_8 = arith.constant 0 : index
    %c0_9 = arith.constant 0 : index
    %9 = vector.load %arg4[%c0_8, %c0_9] : memref<32x1xf32, #tpu.memory_space<vmem>>, vector<32x1xf32>
    %c0_10 = arith.constant 0 : index
    %c0_11 = arith.constant 0 : index
    %10 = vector.load %arg5[%c0_10, %c0_11] : memref<32x8xf32, #tpu.memory_space<vmem>>, vector<32x8xf32>
    %11 = vector.extract_strided_slice %10 {offsets = [0, 0], sizes = [32, 1], strides = [1, 1]} : vector<32x8xf32> to vector<32x1xf32>
    %12 = vector.shape_cast %11 : vector<32x1xf32> to vector<32x1xf32>
    %13 = vector.broadcast %12 : vector<32x1xf32> to vector<32x256xf32>
    %14 = vector.extract_strided_slice %10 {offsets = [0, 1], sizes = [32, 1], strides = [1, 1]} : vector<32x8xf32> to vector<32x1xf32>
    %15 = vector.shape_cast %14 : vector<32x1xf32> to vector<32x1xf32>
    %16 = vector.broadcast %15 : vector<32x1xf32> to vector<32x256xf32>
    %17 = vector.extract_strided_slice %10 {offsets = [0, 2], sizes = [32, 1], strides = [1, 1]} : vector<32x8xf32> to vector<32x1xf32>
    %18 = vector.shape_cast %17 : vector<32x1xf32> to vector<32x1xf32>
    %19 = vector.broadcast %18 : vector<32x1xf32> to vector<32x256xf32>
    %20 = vector.extract_strided_slice %10 {offsets = [0, 3], sizes = [32, 1], strides = [1, 1]} : vector<32x8xf32> to vector<32x1xf32>
    %21 = vector.shape_cast %20 : vector<32x1xf32> to vector<32x1xf32>
    %22 = vector.broadcast %21 : vector<32x1xf32> to vector<32x256xf32>
    %23 = vector.extract_strided_slice %10 {offsets = [0, 4], sizes = [1, 1], strides = [1, 1]} : vector<32x8xf32> to vector<1x1xf32>
    %c0_i32 = arith.constant 0 : i32
    %c1024_i32 = arith.constant 1024 : i32
    %24 = arith.muli %c0_i32, %c1024_i32 : i32
    %25 = tpu.assume_multiple %24, 1024 : i32
    %c0_i32_12 = arith.constant 0 : i32
    %26 = arith.addi %25, %c0_i32_12 : i32
    %27 = tpu.assume_multiple %26, 256 : i32
    %c0_13 = arith.constant 0 : index
    %28 = arith.index_cast %27 : i32 to index
    %29 = vector.load %arg1[%c0_13, %28] : memref<2x1024xf32, #tpu.memory_space<vmem>>, vector<1x256xf32>
    %c1_14 = arith.constant 1 : index
    %30 = arith.index_cast %27 : i32 to index
    %31 = vector.load %arg1[%c1_14, %30] : memref<2x1024xf32, #tpu.memory_space<vmem>>, vector<1x256xf32>
    %32 = vector.broadcast %1 : vector<32x1xf32> to vector<32x256xf32>
    %33 = vector.broadcast %29 : vector<1x256xf32> to vector<32x256xf32>
    %34 = arith.mulf %32, %33 : vector<32x256xf32>
    %35 = vector.broadcast %2 : vector<32x1xf32> to vector<32x256xf32>
    %36 = vector.broadcast %31 : vector<1x256xf32> to vector<32x256xf32>
    %37 = arith.mulf %35, %36 : vector<32x256xf32>
    %38 = arith.addf %34, %37 : vector<32x256xf32>
    %39 = arith.addf %38, %13 : vector<32x256xf32>
    %40 = math.tanh %39 : vector<32x256xf32>
    %cst = arith.constant dense<0.000000e+00> : vector<32x256xf32>
    %41 = tpu.matmul %4, %40, %cst {dimension_numbers = #tpu.dot_dimension_numbers<[1], [0], [0], [1], [0, 0, 1, 1], [], []>} : vector<32x32xf32>, vector<32x256xf32>, vector<32x256xf32> -> vector<32x256xf32>
    %42 = arith.addf %41, %16 : vector<32x256xf32>
    %43 = math.tanh %42 : vector<32x256xf32>
    %cst_15 = arith.constant dense<0.000000e+00> : vector<32x256xf32>
    %44 = tpu.matmul %6, %43, %cst_15 {dimension_numbers = #tpu.dot_dimension_numbers<[1], [0], [0], [1], [0, 0, 1, 1], [], []>} : vector<32x32xf32>, vector<32x256xf32>, vector<32x256xf32> -> vector<32x256xf32>
    %45 = arith.addf %44, %19 : vector<32x256xf32>
    %46 = math.tanh %45 : vector<32x256xf32>
    %cst_16 = arith.constant dense<0.000000e+00> : vector<32x256xf32>
    %47 = tpu.matmul %8, %46, %cst_16 {dimension_numbers = #tpu.dot_dimension_numbers<[1], [0], [0], [1], [0, 0, 1, 1], [], []>} : vector<32x32xf32>, vector<32x256xf32>, vector<32x256xf32> -> vector<32x256xf32>
    %48 = arith.addf %47, %22 : vector<32x256xf32>
    %49 = math.tanh %48 : vector<32x256xf32>
    %50 = vector.broadcast %9 : vector<32x1xf32> to vector<32x256xf32>
    %51 = arith.mulf %49, %50 : vector<32x256xf32>
    %cst_17 = arith.constant dense<0.000000e+00> : vector<256xf32>
    %52 = vector.multi_reduction <add>, %51, %cst_17 [0] : vector<32x256xf32> to vector<256xf32>
    %53 = vector.shape_cast %52 : vector<256xf32> to vector<1x256xf32>
    %54 = vector.broadcast %23 : vector<1x1xf32> to vector<1x256xf32>
    %55 = arith.addf %53, %54 : vector<1x256xf32>
    %c0_18 = arith.constant 0 : index
    %56 = arith.index_cast %27 : i32 to index
    %57 = vector.load %arg6[%c0_18, %56] : memref<1x1024xf32, #tpu.memory_space<vmem>>, vector<1x256xf32>
    tpu.vector_store %arg6[%c0_18, %56], %55 {strides = array<i32>} : memref<1x1024xf32, #tpu.memory_space<vmem>>, vector<1x256xf32>,
    %c256_i32 = arith.constant 256 : i32
    %58 = arith.addi %25, %c256_i32 : i32
    %59 = tpu.assume_multiple %58, 256 : i32
    %c0_19 = arith.constant 0 : index
    %60 = arith.index_cast %59 : i32 to index
    %61 = vector.load %arg1[%c0_19, %60] : memref<2x1024xf32, #tpu.memory_space<vmem>>, vector<1x256xf32>
    %c1_20 = arith.constant 1 : index
    %62 = arith.index_cast %59 : i32 to index
    %63 = vector.load %arg1[%c1_20, %62] : memref<2x1024xf32, #tpu.memory_space<vmem>>, vector<1x256xf32>
    %64 = vector.broadcast %1 : vector<32x1xf32> to vector<32x256xf32>
    %65 = vector.broadcast %61 : vector<1x256xf32> to vector<32x256xf32>
    %66 = arith.mulf %64, %65 : vector<32x256xf32>
    %67 = vector.broadcast %2 : vector<32x1xf32> to vector<32x256xf32>
    %68 = vector.broadcast %63 : vector<1x256xf32> to vector<32x256xf32>
    %69 = arith.mulf %67, %68 : vector<32x256xf32>
    %70 = arith.addf %66, %69 : vector<32x256xf32>
    %71 = arith.addf %70, %13 : vector<32x256xf32>
    %72 = math.tanh %71 : vector<32x256xf32>
    %cst_21 = arith.constant dense<0.000000e+00> : vector<32x256xf32>
    %73 = tpu.matmul %4, %72, %cst_21 {dimension_numbers = #tpu.dot_dimension_numbers<[1], [0], [0], [1], [0, 0, 1, 1], [], []>} : vector<32x32xf32>, vector<32x256xf32>, vector<32x256xf32> -> vector<32x256xf32>
    %74 = arith.addf %73, %16 : vector<32x256xf32>
    %75 = math.tanh %74 : vector<32x256xf32>
    %cst_22 = arith.constant dense<0.000000e+00> : vector<32x256xf32>
    %76 = tpu.matmul %6, %75, %cst_22 {dimension_numbers = #tpu.dot_dimension_numbers<[1], [0], [0], [1], [0, 0, 1, 1], [], []>} : vector<32x32xf32>, vector<32x256xf32>, vector<32x256xf32> -> vector<32x256xf32>
    %77 = arith.addf %76, %19 : vector<32x256xf32>
    %78 = math.tanh %77 : vector<32x256xf32>
    %cst_23 = arith.constant dense<0.000000e+00> : vector<32x256xf32>
    %79 = tpu.matmul %8, %78, %cst_23 {dimension_numbers = #tpu.dot_dimension_numbers<[1], [0], [0], [1], [0, 0, 1, 1], [], []>} : vector<32x32xf32>, vector<32x256xf32>, vector<32x256xf32> -> vector<32x256xf32>
    %80 = arith.addf %79, %22 : vector<32x256xf32>
    %81 = math.tanh %80 : vector<32x256xf32>
    %82 = vector.broadcast %9 : vector<32x1xf32> to vector<32x256xf32>
    %83 = arith.mulf %81, %82 : vector<32x256xf32>
    %cst_24 = arith.constant dense<0.000000e+00> : vector<256xf32>
    %84 = vector.multi_reduction <add>, %83, %cst_24 [0] : vector<32x256xf32> to vector<256xf32>
    %85 = vector.shape_cast %84 : vector<256xf32> to vector<1x256xf32>
    %86 = vector.broadcast %23 : vector<1x1xf32> to vector<1x256xf32>
    %87 = arith.addf %85, %86 : vector<1x256xf32>
    %c0_25 = arith.constant 0 : index
    %88 = arith.index_cast %59 : i32 to index
    %89 = vector.load %arg6[%c0_25, %88] : memref<1x1024xf32, #tpu.memory_space<vmem>>, vector<1x256xf32>
    tpu.vector_store %arg6[%c0_25, %88], %87 {strides = array<i32>} : memref<1x1024xf32, #tpu.memory_space<vmem>>, vector<1x256xf32>,
    %c512_i32 = arith.constant 512 : i32
    %90 = arith.addi %25, %c512_i32 : i32
    %91 = tpu.assume_multiple %90, 256 : i32
    %c0_26 = arith.constant 0 : index
    %92 = arith.index_cast %91 : i32 to index
    %93 = vector.load %arg1[%c0_26, %92] : memref<2x1024xf32, #tpu.memory_space<vmem>>, vector<1x256xf32>
    %c1_27 = arith.constant 1 : index
    %94 = arith.index_cast %91 : i32 to index
    %95 = vector.load %arg1[%c1_27, %94] : memref<2x1024xf32, #tpu.memory_space<vmem>>, vector<1x256xf32>
    %96 = vector.broadcast %1 : vector<32x1xf32> to vector<32x256xf32>
    %97 = vector.broadcast %93 : vector<1x256xf32> to vector<32x256xf32>
    %98 = arith.mulf %96, %97 : vector<32x256xf32>
    %99 = vector.broadcast %2 : vector<32x1xf32> to vector<32x256xf32>
    %100 = vector.broadcast %95 : vector<1x256xf32> to vector<32x256xf32>
    %101 = arith.mulf %99, %100 : vector<32x256xf32>
    %102 = arith.addf %98, %101 : vector<32x256xf32>
    %103 = arith.addf %102, %13 : vector<32x256xf32>
    %104 = math.tanh %103 : vector<32x256xf32>
    %cst_28 = arith.constant dense<0.000000e+00> : vector<32x256xf32>
    %105 = tpu.matmul %4, %104, %cst_28 {dimension_numbers = #tpu.dot_dimension_numbers<[1], [0], [0], [1], [0, 0, 1, 1], [], []>} : vector<32x32xf32>, vector<32x256xf32>, vector<32x256xf32> -> vector<32x256xf32>
    %106 = arith.addf %105, %16 : vector<32x256xf32>
    %107 = math.tanh %106 : vector<32x256xf32>
    %cst_29 = arith.constant dense<0.000000e+00> : vector<32x256xf32>
    %108 = tpu.matmul %6, %107, %cst_29 {dimension_numbers = #tpu.dot_dimension_numbers<[1], [0], [0], [1], [0, 0, 1, 1], [], []>} : vector<32x32xf32>, vector<32x256xf32>, vector<32x256xf32> -> vector<32x256xf32>
    %109 = arith.addf %108, %19 : vector<32x256xf32>
    %110 = math.tanh %109 : vector<32x256xf32>
    %cst_30 = arith.constant dense<0.000000e+00> : vector<32x256xf32>
    %111 = tpu.matmul %8, %110, %cst_30 {dimension_numbers = #tpu.dot_dimension_numbers<[1], [0], [0], [1], [0, 0, 1, 1], [], []>} : vector<32x32xf32>, vector<32x256xf32>, vector<32x256xf32> -> vector<32x256xf32>
    %112 = arith.addf %111, %22 : vector<32x256xf32>
    %113 = math.tanh %112 : vector<32x256xf32>
    %114 = vector.broadcast %9 : vector<32x1xf32> to vector<32x256xf32>
    %115 = arith.mulf %113, %114 : vector<32x256xf32>
    %cst_31 = arith.constant dense<0.000000e+00> : vector<256xf32>
    %116 = vector.multi_reduction <add>, %115, %cst_31 [0] : vector<32x256xf32> to vector<256xf32>
    %117 = vector.shape_cast %116 : vector<256xf32> to vector<1x256xf32>
    %118 = vector.broadcast %23 : vector<1x1xf32> to vector<1x256xf32>
    %119 = arith.addf %117, %118 : vector<1x256xf32>
    %c0_32 = arith.constant 0 : index
    %120 = arith.index_cast %91 : i32 to index
    %121 = vector.load %arg6[%c0_32, %120] : memref<1x1024xf32, #tpu.memory_space<vmem>>, vector<1x256xf32>
    tpu.vector_store %arg6[%c0_32, %120], %119 {strides = array<i32>} : memref<1x1024xf32, #tpu.memory_space<vmem>>, vector<1x256xf32>,
    %c768_i32 = arith.constant 768 : i32
    %122 = arith.addi %25, %c768_i32 : i32
    %123 = tpu.assume_multiple %122, 256 : i32
    %c0_33 = arith.constant 0 : index
    %124 = arith.index_cast %123 : i32 to index
    %125 = vector.load %arg1[%c0_33, %124] : memref<2x1024xf32, #tpu.memory_space<vmem>>, vector<1x256xf32>
    %c1_34 = arith.constant 1 : index
    %126 = arith.index_cast %123 : i32 to index
    %127 = vector.load %arg1[%c1_34, %126] : memref<2x1024xf32, #tpu.memory_space<vmem>>, vector<1x256xf32>
    %128 = vector.broadcast %1 : vector<32x1xf32> to vector<32x256xf32>
    %129 = vector.broadcast %125 : vector<1x256xf32> to vector<32x256xf32>
    %130 = arith.mulf %128, %129 : vector<32x256xf32>
    %131 = vector.broadcast %2 : vector<32x1xf32> to vector<32x256xf32>
    %132 = vector.broadcast %127 : vector<1x256xf32> to vector<32x256xf32>
    %133 = arith.mulf %131, %132 : vector<32x256xf32>
    %134 = arith.addf %130, %133 : vector<32x256xf32>
    %135 = arith.addf %134, %13 : vector<32x256xf32>
    %136 = math.tanh %135 : vector<32x256xf32>
    %cst_35 = arith.constant dense<0.000000e+00> : vector<32x256xf32>
    %137 = tpu.matmul %4, %136, %cst_35 {dimension_numbers = #tpu.dot_dimension_numbers<[1], [0], [0], [1], [0, 0, 1, 1], [], []>} : vector<32x32xf32>, vector<32x256xf32>, vector<32x256xf32> -> vector<32x256xf32>
    %138 = arith.addf %137, %16 : vector<32x256xf32>
    %139 = math.tanh %138 : vector<32x256xf32>
    %cst_36 = arith.constant dense<0.000000e+00> : vector<32x256xf32>
    %140 = tpu.matmul %6, %139, %cst_36 {dimension_numbers = #tpu.dot_dimension_numbers<[1], [0], [0], [1], [0, 0, 1, 1], [], []>} : vector<32x32xf32>, vector<32x256xf32>, vector<32x256xf32> -> vector<32x256xf32>
    %141 = arith.addf %140, %19 : vector<32x256xf32>
    %142 = math.tanh %141 : vector<32x256xf32>
    %cst_37 = arith.constant dense<0.000000e+00> : vector<32x256xf32>
    %143 = tpu.matmul %8, %142, %cst_37 {dimension_numbers = #tpu.dot_dimension_numbers<[1], [0], [0], [1], [0, 0, 1, 1], [], []>} : vector<32x32xf32>, vector<32x256xf32>, vector<32x256xf32> -> vector<32x256xf32>
    %144 = arith.addf %143, %22 : vector<32x256xf32>
    %145 = math.tanh %144 : vector<32x256xf32>
    %146 = vector.broadcast %9 : vector<32x1xf32> to vector<32x256xf32>
    %147 = arith.mulf %145, %146 : vector<32x256xf32>
    %cst_38 = arith.constant dense<0.000000e+00> : vector<256xf32>
    %148 = vector.multi_reduction <add>, %147, %cst_38 [0] : vector<32x256xf32> to vector<256xf32>
    %149 = vector.shape_cast %148 : vector<256xf32> to vector<1x256xf32>
    %150 = vector.broadcast %23 : vector<1x1xf32> to vector<1x256xf32>
    %151 = arith.addf %149, %150 : vector<1x256xf32>
    %c0_39 = arith.constant 0 : index
    %152 = arith.index_cast %123 : i32 to index
    %153 = vector.load %arg6[%c0_39, %152] : memref<1x1024xf32, #tpu.memory_space<vmem>>, vector<1x256xf32>
    tpu.vector_store %arg6[%c0_39, %152], %151 {strides = array<i32>} : memref<1x1024xf32, #tpu.memory_space<vmem>>, vector<1x256xf32>,
    %c1_i32 = arith.constant 1 : i32
    return
  }
  func.func @transform_0(%arg0: i32) -> (i32, i32) {
    %c0_i32 = arith.constant 0 : i32
    %c0_i32_0 = arith.constant 0 : i32
    return %c0_i32, %arg0 : i32, i32
  }
  func.func @transform_1(%arg0: i32) -> (i32, i32) {
    %c0_i32 = arith.constant 0 : i32
    %c0_i32_0 = arith.constant 0 : i32
    %c0_i32_1 = arith.constant 0 : i32
    return %c0_i32, %c0_i32_0 : i32, i32
  }
  func.func @transform_2(%arg0: i32) -> (i32, i32, i32) {
    %c0_i32 = arith.constant 0 : i32
    %c0_i32_0 = arith.constant 0 : i32
    %c0_i32_1 = arith.constant 0 : i32
    %c0_i32_2 = arith.constant 0 : i32
    return %c0_i32, %c0_i32_0, %c0_i32_1 : i32, i32, i32
  }
  func.func @transform_3(%arg0: i32) -> (i32, i32) {
    %c0_i32 = arith.constant 0 : i32
    %c0_i32_0 = arith.constant 0 : i32
    %c0_i32_1 = arith.constant 0 : i32
    return %c0_i32, %c0_i32_0 : i32, i32
  }
  func.func @transform_4(%arg0: i32) -> (i32, i32) {
    %c0_i32 = arith.constant 0 : i32
    %c0_i32_0 = arith.constant 0 : i32
    %c0_i32_1 = arith.constant 0 : i32
    return %c0_i32, %c0_i32_0 : i32, i32
  }
  func.func @transform_5(%arg0: i32) -> (i32, i32) {
    %c0_i32 = arith.constant 0 : i32
    %c0_i32_0 = arith.constant 0 : i32
    return %c0_i32, %arg0 : i32, i32
  }
}

</mosaic_0001>

<bundles_post_ra>
// kernel: tpu_custom_call.1
= control target key start
LH: loop header
LB: loop body
LE: loop exit
PB: predicated region body
PF: predicated region fallthrough
CT: control target
= control target key end

     0   :  { %10 = vsyncpa [#allocation3], 0  ;;  %s2641_s0 = inlined_call_operand.vmem [shape: f32[2,1024], index: 0, kind: input, shape index: {}]   ;;  %s2642_s1 = inlined_call_operand.vmem [shape: f32[32,2], index: 1, kind: input, shape index: {}]   ;;  %s2643_s2 = inlined_call_operand.hbm [shape: f32[3,32,32], index: 2, kind: input, shape index: {}]   ;;  %s2644_s3 = inlined_call_operand.vmem [shape: f32[32,1], index: 3, kind: input, shape index: {}]   ;;  %s2645_s4 = inlined_call_operand.vmem [shape: f32[32,8], index: 4, kind: input, shape index: {}]   ;;  %s2646_s5 = inlined_call_operand.hbm [shape: f32[1,1024], index: 5, kind: output, shape index: {}]  }
   0x1   :  { %11 = vsyncpa [#allocation4], 0  ;;  %s20_s20 = sshll.u32 %s2643_s2, 4  ;;  %s1866_s21 = smov [#allocation2]   ;;  %s21_s20 = int_to_ptr.hbm [resolvable:$true] %s20_s20 }
   0x2   :  { %s22_s22 = sshll.u32 %s1866_s21, 4  ;;  %s1867_s23 = smov 128   ;;  %s23_s22 = int_to_ptr.vmem [resolvable:$true] %s22_s22 }
   0x3   :  { %s1868_s24 = smov 8  }
   0x4   :  { %28 = dma.hbm_to_vmem [thread:$0]  %s21_s20, 1536, %s23_s22, [#allocation3], %s1867_s23, %s1867_s23, %s1868_s24  }
   0x5   :  { %1862 = dma.done.wait [#allocation3], 1536  }
   0x6   :  { %1863 = vsyncadd [#allocation3], 4294965760  ;;  %v1869_v0 = vmov 1   ;;  %v1870_v1 = vmov 0   ;;  %v40_v2 = vld [vmem:[%s2642_s1 + $0x18] sm:$0xff]  ;;  %v39_v3 = vld [vmem:[%s2642_s1 + $0x10] sm:$0xff] }
   0x7   :  { %1532 = vset.pattern.permute.xlu0 %v1869_v0  ;;  %1534 = vset.pattern.permute.xlu1 %v1870_v1  ;;  %v1919_v4 = vld [vmem:[%s2645_s4 + $0x18] sm:$0xff]  ;;  %v38_v5 = vld [vmem:[%s2642_s1 + $0x8] sm:$0xff]  ;;  %v37_v6 = vld [vmem:[%s2642_s1] sm:$0xff]  ;;  %vm220_vm0 = vcmask 261120   ;;  %vm510_vm1 = vcmask 1040384   ;;  %s1398_s1 = sshll.u32 %s2646_s5, 4  ;;  %s1399_s1 = int_to_ptr.hbm [resolvable:$true] %s1398_s1 }
   0x8   :  { %1536 = vset.pattern.permute.xlu2 %v1870_v1  ;;  %180 = vperm.xlu0 %1532, %v40_v2   ;;  %v1932_v7 = vld [vmem:[%s2645_s4 + $0x10] sm:$0xff]  ;;  %v1938_v8 = vld [vmem:[%s2645_s4 + $0x8] sm:$0xff]  ;;  %v1945_v9 = vld [vmem:[%s2645_s4] sm:$0xff] }
   0x9   :  { %146 = vperm.xlu1 %1534, %v39_v3   ;;  %80 = vperm.xlu2 %1536, %v1919_v4   ;;  %v1471_v12 = vld [vmem:[%s2641_s0 + $0x9] ss:$2 sm:$0x3]  ;;  %v1469_v14 = vld [vmem:[%s2641_s0 + $0x8] ss:$2 sm:$0x3] }
   0xa   :  { %v1498_v16 = vld [vmem:[%s2641_s0 + $0xd] ss:$2 sm:$0x3]  ;;  %v1496_v17 = vld [vmem:[%s2641_s0 + $0xc] ss:$2 sm:$0x3] }
   0xb   :  { %v131_v18 = vld [vmem:[%s2641_s0] ss:$2 sm:$0x3]  ;;  %v1417_v19 = vld [vmem:[%s2641_s0 + $0x1] ss:$2 sm:$0x3] }
   0xc   :  { %v1976_v20 = vperm.slane %v1471_v12, 0  ;;  %v1978_v21 = vperm.slane %v1469_v14, 0  ;;  %v1980_v22 = vperm.slane %v1469_v14, 1  ;;  %v1442_v23 = vld [vmem:[%s2641_s0 + $0x4] ss:$2 sm:$0x3] }
   0xd   :  { %v1985_v24 = vperm.slane %v1471_v12, 1  ;;  %v1987_v25 = vperm.slane %v1498_v16, 0  ;;  %v1989_v26 = vperm.slane %v1498_v16, 1  ;;  %v1444_v27 = vld [vmem:[%s2641_s0 + $0x5] ss:$2 sm:$0x3] }
   0xe   :  { %v1994_v28 = vperm.slane %v131_v18, 0  ;;  %v1996_v29 = vperm.slane %v1417_v19, 0  ;;  %v1998_v30 = vperm.slane %v131_v18, 1  ;;  %v2000_v31 = vperm.slane %v1417_v19, 1 }
   0xf   :  { %v2002_v32 = vperm.slane %v1496_v17, 0  ;;  %v2004_v33 = vperm.slane %v1496_v17, 1  ;;  %v2006_v34 = vperm.slane %v1442_v23, 0  ;;  %v2008_v35 = vperm.slane %v1442_v23, 1 }
  0x10   :  { %1533 = vset.pattern.permute.xlu0 %v1870_v1  ;;  %v2014_v38 = vperm.slane %v1444_v27, 0  ;;  %v2016_v39 = vperm.slane %v1444_v27, 1 }
  0x11   :  { %1535 = vset.pattern.permute.xlu1 %v1869_v0  ;;  %151 = vperm.xlu0 %1533, %v40_v2  }
  0x12   :  { %176 = vperm.xlu1 %1535, %v39_v3   ;;  %141 = vperm.xlu2 %1536, %v38_v5  }
  0x19   :  { %136 = vperm.xlu0 %1533, %v37_v6  }
  0x1a   :  { %172 = vperm.xlu1 %1535, %v38_v5   ;;  %75 = vperm.xlu2 %1536, %v1932_v7  }
  0x21   :  { %1539 = vset.pattern.permute.xlu0 %v1869_v0 }
  0x22   :  { %168 = vperm.xlu1 %1535, %v37_v6   ;;  %70 = vperm.xlu2 %1536, %v1938_v8  }
  0x23   :  { %92 = vperm.xlu0 %1539, %v1932_v7  }
  0x2a   :  { %1537 = vset.pattern.permute.xlu1 %v1870_v1  ;;  %1538 = vset.pattern.permute.xlu2 %v1869_v0 }
  0x2b   :  { %65 = vperm.xlu1 %1537, %v1945_v9   ;;  %96 = vperm.xlu2 %1538, %v1919_v4  }
  0x33   :  { %1540 = vset.pattern.permute.xlu1 %v1869_v0  ;;  %84 = vperm.xlu2 %1538, %v1945_v9  }
  0x34   :  { %88 = vperm.xlu1 %1540, %v1938_v8  }
  0x63   :  { %v1952_v10 = vpop.permute.xlu2 %80 }
  0x6c   :  { %v1962_v15 = vpop.permute.xlu2 %141 }
  0x6d   :  { %v161_v36 = vmul.f32 %v1994_v28, %v1962_v15  ;;  %v162_v37 = vmul.f32 %v1998_v30, %v1962_v15  ;;  %v2030_v49 = vmul.f32 %v2006_v34, %v1962_v15  ;;  %v534_v19 = vmul.f32 %v2008_v35, %v1962_v15 }
  0x74   :  { %v2036_v54 = vpop.permute.xlu2 %75 }
  0x7a   :  { %v181_v13 = vpop.permute.xlu0 %180 }
  0x7b   :  { %v1954_v11 = vpop.permute.xlu1 %146  ;;  %v841_v40 = vmul.f32 %v1976_v20, %v181_v13  ;;  %v842_v41 = vmul.f32 %v1985_v24, %v181_v13  ;;  %v1132_v42 = vmul.f32 %v1987_v25, %v181_v13  ;;  %v1133_v43 = vmul.f32 %v1989_v26, %v181_v13 }
  0x7c   :  { %v194_v46 = vmul.f32 %v1996_v29, %v181_v13  ;;  %v195_v47 = vmul.f32 %v2000_v31, %v181_v13  ;;  %v163_v48 = vmul.f32 %v1994_v28, %v1954_v11  ;;  %v164_v3 = vmul.f32 %v1998_v30, %v1954_v11 }
  0x7d   :  { %v550_v17 = vmul.f32 %v2014_v38, %v181_v13  ;;  %v551_v18 = vmul.f32 %v2016_v39, %v181_v13  ;;  %v536_v13 = vmul.f32 %v2008_v35, %v1954_v11 }
  0x83   :  { %v152_v44 = vpop.permute.xlu0 %151 }
  0x84   :  { %v2022_v45 = vpop.permute.xlu1 %176  ;;  %v828_v50 = vmul.f32 %v1978_v21, %v152_v44  ;;  %v829_v51 = vmul.f32 %v1980_v22, %v152_v44  ;;  %v1119_v52 = vmul.f32 %v2002_v32, %v152_v44  ;;  %v1120_v53 = vmul.f32 %v2004_v33, %v152_v44 }
  0x85   :  { %v165_v55 = vmul.f32 %v1994_v28, %v152_v44  ;;  %v166_v56 = vmul.f32 %v1998_v30, %v152_v44  ;;  %v192_v57 = vmul.f32 %v1996_v29, %v2022_v45  ;;  %v193_v58 = vmul.f32 %v2000_v31, %v2022_v45 }
  0x86   :  { %v849_v59 = vadd.f32 %v841_v40, %v828_v50  ;;  %v850_v60 = vadd.f32 %v842_v41, %v829_v51  ;;  %v1140_v61 = vadd.f32 %v1132_v42, %v1119_v52  ;;  %v1141_v62 = vadd.f32 %v1133_v43, %v1120_v53 }
  0x87   :  { %v202_v63 = vadd.f32 %v194_v46, %v165_v55  ;;  %v203_v0 = vadd.f32 %v195_v47, %v166_v56  ;;  %v200_v2 = vadd.f32 %v192_v57, %v163_v48  ;;  %v201_v16 = vadd.f32 %v193_v58, %v164_v3 }
  0x88   :  { %v2047_v5 = vadd.f32 %v849_v59, %v1952_v10  ;;  %v2050_v6 = vadd.f32 %v850_v60, %v1952_v10  ;;  %v2053_v12 = vadd.f32 %v1140_v61, %v1952_v10  ;;  %v2056_v14 = vadd.f32 %v1141_v62, %v1952_v10  ;;  %v2086_v60 = vpop.permute.xlu2 %70 }
  0x89   :  { %v210_v23 = vadd.f32 %v202_v63, %v1952_v10  ;;  %v537_v27 = vmul.f32 %v2006_v34, %v152_v44  ;;  %v538_v40 = vmul.f32 %v2008_v35, %v152_v44  ;;  %v535_v41 = vmul.f32 %v2006_v34, %v1954_v11 }
  0x8a   :  { %v211_v43 = vadd.f32 %v203_v0, %v1952_v10  ;;  %v548_v46 = vmul.f32 %v2014_v38, %v2022_v45  ;;  %v549_v47 = vmul.f32 %v2016_v39, %v2022_v45  ;;  %v208_v48 = vadd.f32 %v200_v2, %v2036_v54 }
  0x8b   :  { %v826_v51 = vmul.f32 %v1978_v21, %v1954_v11  ;;  %v209_v52 = vadd.f32 %v201_v16, %v2036_v54  ;;  %v558_v53 = vadd.f32 %v550_v17, %v537_v27  ;;  %v559_v55 = vadd.f32 %v551_v18, %v538_v40 }
  0x8c   :  { %v2067_v42 = vpop.permute.xlu1 %172  ;;  %v839_v56 = vmul.f32 %v1976_v20, %v2022_v45  ;;  %1550 = vtanh.f32 %v210_v23  ;;  %v556_v59 = vadd.f32 %v548_v46, %v535_v41  ;;  %v557_v63 = vadd.f32 %v549_v47, %v536_v13 }
  0x8d   :  { %v190_v44 = vmul.f32 %v1996_v29, %v2067_v42  ;;  %v191_v50 = vmul.f32 %v2000_v31, %v2067_v42  ;;  %1552 = vtanh.f32 %v211_v43  ;;  %v2089_v61 = vadd.f32 %v558_v53, %v1952_v10 }
  0x8e   :  { %v2092_v62 = vadd.f32 %v559_v55, %v1952_v10  ;;  %1554 = vtanh.f32 %v208_v48  ;;  %v2097_v3 = vadd.f32 %v556_v59, %v2036_v54  ;;  %v547_v10 = vmul.f32 %v2016_v39, %v2067_v42  ;;  %v2119_v48 = vpop.permute.xlu0 %136 }
  0x8f   :  { %v198_v57 = vadd.f32 %v190_v44, %v161_v36  ;;  %v199_v58 = vadd.f32 %v191_v50, %v162_v37  ;;  %1556 = vtanh.f32 %v209_v52  ;;  %v2100_v36 = vadd.f32 %v557_v63, %v2036_v54 }
  0x90   :  { %v546_v37 = vmul.f32 %v2014_v38, %v2067_v42  ;;  %v847_v16 = vadd.f32 %v839_v56, %v826_v51  ;;  %v555_v23 = vadd.f32 %v547_v10, %v534_v19  ;;  %v840_v27 = vmul.f32 %v1985_v24, %v2022_v45 }
  0x91   :  { %v206_v0 = vadd.f32 %v198_v57, %v2086_v60  ;;  %v207_v2 = vadd.f32 %v199_v58, %v2086_v60  ;;  %v827_v13 = vmul.f32 %v1980_v22, %v1954_v11  ;;  %v824_v53 = vmul.f32 %v1978_v21, %v1962_v15 }
  0x92   :  { %v554_v18 = vadd.f32 %v546_v37, %v2030_v49  ;;  %v1551_v40 = vpop.eup %1550  ;;  %v2115_v46 = vadd.f32 %v555_v23, %v2086_v60  ;;  %v2126_v50 = vadd.f32 %v847_v16, %v2036_v54  ;;  %v837_v55 = vmul.f32 %v1976_v20, %v2067_v42 }
  0x93   :  { %1558 = vtanh.f32 %v206_v0  ;;  %v1553_v41 = vpop.eup %1552  ;;  %245 = vmatpush.msra.mxu0 %v1551_v40  ;;  %v848_v51 = vadd.f32 %v840_v27, %v827_v13  ;;  %v825_v56 = vmul.f32 %v1980_v22, %v1962_v15  ;;  %v160_v58 = vmul.f32 %v1998_v30, %v2119_v48 }
  0x94   :  { %v2106_v17 = vpop.permute.xlu1 %168  ;;  %1560 = vtanh.f32 %v207_v2  ;;  %v2112_v43 = vadd.f32 %v554_v18, %v2086_v60  ;;  %v1555_v47 = vpop.eup %1554  ;;  %274 = vmatpush.msra.mxu1 %v1553_v41  ;;  %v845_v63 = vadd.f32 %v837_v55, %v824_v53  ;;  %v1130_v10 = vmul.f32 %v1987_v25, %v2022_v45 }
  0x95   :  { %v1557_v49 = vpop.eup %1556  ;;  %246 = vmatpush.msra.mxu0 %v1555_v47  ;;  %v188_v19 = vmul.f32 %v1996_v29, %v2106_v17  ;;  %v189_v44 = vmul.f32 %v2000_v31, %v2106_v17  ;;  %v838_v29 = vmul.f32 %v1985_v24, %v2067_v42  ;;  %v159_v31 = vmul.f32 %v1994_v28, %v2119_v48 }
  0x96   :  { %275 = vmatpush.msra.mxu1 %v1557_v49  ;;  %v2141_v59 = vadd.f32 %v848_v51, %v2036_v54  ;;  %v1131_v16 = vmul.f32 %v1989_v26, %v2022_v45  ;;  %v2150_v28 = vadd.f32 %v845_v63, %v2086_v60  ;;  %v1117_v23 = vmul.f32 %v2002_v32, %v1954_v11 }
  0x97   :  { %v846_v0 = vadd.f32 %v838_v29, %v825_v56  ;;  %v196_v2 = vadd.f32 %v188_v19, %v159_v31  ;;  %v197_v37 = vadd.f32 %v189_v44, %v160_v58  ;;  %v1128_v27 = vmul.f32 %v1987_v25, %v2067_v42 }
  0x98   :  { %v1118_v45 = vmul.f32 %v2004_v33, %v1954_v11  ;;  %v1115_v13 = vmul.f32 %v2002_v32, %v1962_v15  ;;  %v1138_v47 = vadd.f32 %v1130_v10, %v1117_v23  ;;  %v1116_v49 = vmul.f32 %v2004_v33, %v1962_v15  ;;  %v2181_v15 = vld [vmem:[#allocation2] sm:$0xff]  ;;  %v2210_v23 = vpop.permute.xlu0 %92 }
  0x99   :  { %v1559_v52 = vpop.eup %1558  ;;  %v2153_v30 = vadd.f32 %v846_v0, %v2086_v60  ;;  %v1129_v51 = vmul.f32 %v1989_v26, %v2067_v42  ;;  %v2193_v42 = vld [vmem:[#allocation2 + $0x10] sm:$0xff] }
  0x9a   :  { %v1561_v57 = vpop.eup %1560  ;;  %247 = vmatpush.msra.mxu0 %v1559_v52  ;;  %v1139_v19 = vadd.f32 %v1131_v16, %v1118_v45  ;;  %v1136_v44 = vadd.f32 %v1128_v27, %v1115_v13  ;;  %v2170_v52 = vadd.f32 %v1138_v47, %v2036_v54  ;;  %v1871_v16 = vmov 2  }
  0x9b   :  { %276 = vmatpush.msra.mxu1 %v1561_v57  ;;  %v1137_v55 = vadd.f32 %v1129_v51, %v1116_v49  ;;  %1541 = vset.pattern.permute.xlu1 %v1871_v16 }
  0x9c   :  { %v2173_v53 = vadd.f32 %v1139_v19, %v2036_v54  ;;  %v2176_v11 = vadd.f32 %v1136_v44, %v2086_v60  ;;  %v2187_v54 = vld [vmem:[#allocation2 + $0x8] sm:$0xff]  ;;  %1543 = vset.pattern.permute.xlu0 %v1871_v16  ;;  %112 = vperm.xlu1 %1541, %v1919_v4  }
  0x9d   :  { %v2147_v18 = vpop.permute.xlu1 %65  ;;  %v2179_v56 = vadd.f32 %v1137_v55, %v2086_v60  ;;  %v2199_v60 = vld [vmem:[#allocation2 + $0x18] sm:$0xff]  ;;  %104 = vperm.xlu0 %1543, %v1938_v8   ;;  %1542 = vset.pattern.permute.xlu2 %v1871_v16 }
  0x9e   :  { %v204_v40 = vadd.f32 %v196_v2, %v2147_v18  ;;  %v205_v41 = vadd.f32 %v197_v37, %v2147_v18  ;;  %v2205_v37 = vpop.permute.xlu2 %96  ;;  %108 = vperm.xlu2 %1542, %v1932_v7  }
  0xa0   :  { %1562 = vtanh.f32 %v204_v40 }
  0xa1   :  { %1564 = vtanh.f32 %v205_v41 }
  0xa4   :  { %100 = vperm.xlu1 %1541, %v1945_v9  }
  0xa6   :  { %v1563_v29 = vpop.eup %1562  ;;  %v2212_v40 = vpop.permute.xlu1 %88 }
  0xa7   :  { %v1565_v57 = vpop.eup %1564  ;;  %248 = vmatpush.msra.mxu0 %v1563_v29  ;;  %v2218_v19 = vpop.permute.xlu2 %84 }
  0xa8   :  { %277 = vmatpush.msra.mxu1 %v1565_v57  ;;  %1418 = vmatmul.msk.f32.vlgmr.msra.gmra.mxu0 %vm220_vm0, %v2181_v15  ;;  %v544_v57 = vmul.f32 %v2014_v38, %v2106_v17 }
  0xa9   :  { %1422 = vmatmul.msk.f32.vlgmr.msra.gmra.mxu1 %vm220_vm0, %v2181_v15 }
  0xb0   :  { %1419 = vmatmul.msk.f32.gmra.mxu0 %vm220_vm0, %v2187_v54 }
  0xb1   :  { %1423 = vmatmul.msk.f32.gmra.mxu1 %vm220_vm0, %v2187_v54 }
  0xb8   :  { %1420 = vmatmul.msk.f32.gmra.mxu0 %vm220_vm0, %v2193_v42 }
  0xb9   :  { %1424 = vmatmul.msk.f32.gmra.mxu1 %vm220_vm0, %v2193_v42 }
  0xc0   :  { %1421 = vmatmul.msk.f32.gmra.mxu0 %vm220_vm0, %v2199_v60 }
  0xc1   :  { %1425 = vmatmul.msk.f32.gmra.mxu1 %vm220_vm0, %v2199_v60 }
 0x125   :  { %v250_v31 = vpop.f32.mrf.mxu0 }
 0x126   :  { %v279_v58 = vpop.f32.mrf.mxu1  ;;  %v251_v55 = vadd.f32 %v250_v31, %v2218_v19  ;;  %v532_v31 = vmul.f32 %v2008_v35, %v2119_v48 }
 0x127   :  { %v280_v29 = vadd.f32 %v279_v58, %v2218_v19 }
 0x12d   :  { %v253_v63 = vpop.f32.mrf.mxu0 }
 0x12e   :  { %v282_v0 = vpop.f32.mrf.mxu1  ;;  %v254_v44 = vadd.f32 %v253_v63, %v2212_v40  ;;  %v545_v63 = vmul.f32 %v2016_v39, %v2106_v17 }
 0x12f   :  { %v283_v51 = vadd.f32 %v282_v0, %v2212_v40  ;;  %v531_v0 = vmul.f32 %v2006_v34, %v2119_v48 }
 0x130   :  { %v553_v39 = vadd.f32 %v545_v63, %v532_v31  ;;  %v2281_v31 = vpop.permute.xlu1 %112 }
 0x131   :  { %v552_v38 = vadd.f32 %v544_v57, %v531_v0 }
 0x132   :  { %v561_v35 = vadd.f32 %v553_v39, %v2147_v18 }
 0x133   :  { %v560_v34 = vadd.f32 %v552_v38, %v2147_v18  ;;  %v1872_v38 = vmov 3  }
 0x134   :  { %1545 = vset.pattern.permute.xlu1 %v1872_v38  ;;  %1544 = vset.pattern.permute.xlu2 %v1872_v38 }
 0x135   :  { %v256_v2 = vpop.f32.mrf.mxu0  ;;  %120 = vperm.xlu1 %1545, %v1938_v8   ;;  %1546 = vset.pattern.permute.xlu0 %v1872_v38 }
 0x136   :  { %v285_v10 = vpop.f32.mrf.mxu1  ;;  %v257_v13 = vadd.f32 %v256_v2, %v2210_v23  ;;  %116 = vperm.xlu2 %1544, %v1945_v9   ;;  %128 = vperm.xlu0 %1546, %v1919_v4  }
 0x137   :  { %v286_v49 = vadd.f32 %v285_v10, %v2210_v23 }
 0x138   :  { %v2294_v8 = vpop.permute.xlu1 %100 }
 0x13d   :  { %v259_v27 = vpop.f32.mrf.mxu0  ;;  %1547 = vset.pattern.permute.xlu1 %v1870_v1 }
 0x13e   :  { %v260_v41 = vadd.f32 %v259_v27, %v2205_v37  ;;  %v288_v45 = vpop.f32.mrf.mxu1  ;;  %124 = vperm.xlu2 %1544, %v1932_v7  }
 0x13f   :  { %v289_v47 = vadd.f32 %v288_v45, %v2205_v37  ;;  %v2237_v45 = vld [vmem:[#allocation2 + $0x20] sm:$0xff] }
 0x140   :  { %1566 = vtanh.f32 %v260_v41 }
 0x141   :  { %1568 = vtanh.f32 %v289_v47 }
 0x142   :  { %1570 = vtanh.f32 %v257_v13 }
 0x143   :  { %1572 = vtanh.f32 %v286_v49 }
 0x144   :  { %1574 = vtanh.f32 %v254_v44 }
 0x145   :  { %1576 = vtanh.f32 %v283_v51 }
 0x146   :  { %v1567_v2 = vpop.eup %1566  ;;  %1578 = vtanh.f32 %v251_v55  ;;  %v2253_v55 = vld [vmem:[#allocation2 + $0x30] sm:$0xff]  ;;  %1548 = vset.pattern.permute.xlu2 %v1870_v1 }
 0x147   :  { %v1569_v10 = vpop.eup %1568  ;;  %1580 = vtanh.f32 %v280_v29  ;;  %323 = vmatpush.msra.mxu2 %v1567_v2  ;;  %v2259_v29 = vld [vmem:[#allocation2 + $0x38] sm:$0xff] }
 0x148   :  { %v1571_v58 = vpop.eup %1570  ;;  %352 = vmatpush.msra.mxu3 %v1569_v10  ;;  %1582 = vtanh.f32 %v2089_v61 }
 0x149   :  { %v1573_v16 = vpop.eup %1572  ;;  %324 = vmatpush.msra.mxu2 %v1571_v58  ;;  %1584 = vtanh.f32 %v2092_v62 }
 0x14a   :  { %v1575_v27 = vpop.eup %1574  ;;  %353 = vmatpush.msra.mxu3 %v1573_v16  ;;  %1586 = vtanh.f32 %v2097_v3  ;;  %v2284_v16 = vpop.permute.xlu2 %108 }
 0x14b   :  { %v1577_v41 = vpop.eup %1576  ;;  %325 = vmatpush.msra.mxu2 %v1575_v27  ;;  %1588 = vtanh.f32 %v2100_v36  ;;  %v2288_v27 = vpop.permute.xlu0 %104 }
 0x14c   :  { %v1579_v61 = vpop.eup %1578  ;;  %354 = vmatpush.msra.mxu3 %v1577_v41  ;;  %1590 = vtanh.f32 %v2112_v43 }
 0x14d   :  { %v1581_v62 = vpop.eup %1580  ;;  %326 = vmatpush.msra.mxu2 %v1579_v61  ;;  %1592 = vtanh.f32 %v2115_v46  ;;  %v2247_v46 = vld [vmem:[#allocation2 + $0x28] sm:$0xff] }
 0x14e   :  { %v1583_v13 = vpop.eup %1582  ;;  %355 = vmatpush.msra.mxu3 %v1581_v62  ;;  %1426 = vmatmul.msk.f32.vlgmr.msra.gmra.mxu2 %vm220_vm0, %v2237_v45  ;;  %1594 = vtanh.f32 %v560_v34 }
 0x14f   :  { %v1585_v3 = vpop.eup %1584  ;;  %1430 = vmatmul.msk.f32.vlgmr.msra.gmra.mxu3 %vm220_vm0, %v2237_v45  ;;  %588 = vmatpush.msrb.mxu2 %v1583_v13  ;;  %1596 = vtanh.f32 %v561_v35 }
 0x150   :  { %v1587_v36 = vpop.eup %1586  ;;  %617 = vmatpush.msrb.mxu3 %v1585_v3  ;;  %v55_v3 = vld [vmem:[%s2644_s3] sm:$0xff] }
 0x151   :  { %v1589_v47 = vpop.eup %1588  ;;  %589 = vmatpush.msrb.mxu2 %v1587_v36  ;;  %457 = vperm.xlu1 %1547, %v55_v3  }
 0x152   :  { %v1591_v43 = vpop.eup %1590  ;;  %618 = vmatpush.msrb.mxu3 %v1589_v47 }
 0x153   :  { %v1593_v49 = vpop.eup %1592  ;;  %590 = vmatpush.msrb.mxu2 %v1591_v43 }
 0x154   :  { %v1595_v44 = vpop.eup %1594  ;;  %619 = vmatpush.msrb.mxu3 %v1593_v49 }
 0x155   :  { %v1597_v51 = vpop.eup %1596  ;;  %591 = vmatpush.msrb.mxu2 %v1595_v44 }
 0x156   :  { %620 = vmatpush.msrb.mxu3 %v1597_v51  ;;  %1427 = vmatmul.msk.f32.gmra.mxu2 %vm220_vm0, %v2247_v46 }
 0x157   :  { %1431 = vmatmul.msk.f32.gmra.mxu3 %vm220_vm0, %v2247_v46 }
 0x15e   :  { %1428 = vmatmul.msk.f32.gmra.mxu2 %vm220_vm0, %v2253_v55 }
 0x15f   :  { %1432 = vmatmul.msk.f32.gmra.mxu3 %vm220_vm0, %v2253_v55 }
 0x166   :  { %1429 = vmatmul.msk.f32.gmra.mxu2 %vm220_vm0, %v2259_v29 }
 0x167   :  { %1433 = vmatmul.msk.f32.gmra.mxu3 %vm220_vm0, %v2259_v29 }
 0x16e   :  { %1445 = vmatmul.msk.f32.vlgmr.msrb.gmra.mxu2 %vm220_vm0, %v2181_v15 }
 0x16f   :  { %1449 = vmatmul.msk.f32.vlgmr.msrb.gmra.mxu3 %vm220_vm0, %v2181_v15 }
 0x176   :  { %1446 = vmatmul.msk.f32.gmra.mxu2 %vm220_vm0, %v2187_v54 }
 0x177   :  { %1450 = vmatmul.msk.f32.gmra.mxu3 %vm220_vm0, %v2187_v54 }
 0x17e   :  { %1447 = vmatmul.msk.f32.gmra.mxu2 %vm220_vm0, %v2193_v42 }
 0x17f   :  { %1451 = vmatmul.msk.f32.gmra.mxu3 %vm220_vm0, %v2193_v42 }
 0x186   :  { %1448 = vmatmul.msk.f32.gmra.mxu2 %vm220_vm0, %v2199_v60 }
 0x187   :  { %1452 = vmatmul.msk.f32.gmra.mxu3 %vm220_vm0, %v2199_v60 }
 0x1d1   :  { %v328_v57 = vpop.f32.mrf.mxu2 }
 0x1d2   :  { %v357_v63 = vpop.f32.mrf.mxu3  ;;  %v329_v36 = vadd.f32 %v328_v57, %v2294_v8 }
 0x1d3   :  { %v358_v47 = vadd.f32 %v357_v63, %v2294_v8 }
 0x1d9   :  { %v331_v2 = vpop.f32.mrf.mxu2 }
 0x1da   :  { %v360_v0 = vpop.f32.mrf.mxu3  ;;  %v332_v13 = vadd.f32 %v331_v2, %v2288_v27 }
 0x1db   :  { %v361_v4 = vadd.f32 %v360_v0, %v2288_v27 }
 0x1e1   :  { %v334_v10 = vpop.f32.mrf.mxu2 }
 0x1e2   :  { %v363_v58 = vpop.f32.mrf.mxu3  ;;  %v335_v34 = vadd.f32 %v334_v10, %v2284_v16  ;;  %v2305_v10 = vld [vmem:[#allocation2 + $0x40] sm:$0xff] }
 0x1e3   :  { %v364_v61 = vadd.f32 %v363_v58, %v2284_v16 }
 0x1e9   :  { %v337_v39 = vpop.f32.mrf.mxu2 }
 0x1ea   :  { %v338_v41 = vadd.f32 %v337_v39, %v2281_v31  ;;  %v366_v35 = vpop.f32.mrf.mxu3 }
 0x1eb   :  { %v367_v62 = vadd.f32 %v366_v35, %v2281_v31 }
 0x1ec   :  { %1598 = vtanh.f32 %v338_v41  ;;  %v2315_v41 = vld [vmem:[#allocation2 + $0x48] sm:$0xff] }
 0x1ed   :  { %1600 = vtanh.f32 %v367_v62 }
 0x1ee   :  { %1602 = vtanh.f32 %v335_v34  ;;  %v57_v34 = vld [vmem:[%s2644_s3 + $0x10] sm:$0xff] }
 0x1ef   :  { %1604 = vtanh.f32 %v364_v61  ;;  %467 = vperm.xlu1 %1547, %v57_v34   ;;  %v2321_v61 = vld [vmem:[#allocation2 + $0x50] sm:$0xff]  ;;  %v1873_v34 = vmov 4  }
 0x1f0   :  { %1606 = vtanh.f32 %v332_v13  ;;  %1549 = vset.pattern.permute.xlu0 %v1873_v34 }
 0x1f1   :  { %v593_v43 = vpop.f32.mrf.mxu2  ;;  %1608 = vtanh.f32 %v361_v4  ;;  %502 = vperm.xlu0 %1549, %v1945_v9  }
 0x1f2   :  { %v1599_v49 = vpop.eup %1598  ;;  %1610 = vtanh.f32 %v329_v36  ;;  %v622_v44 = vpop.f32.mrf.mxu3 }
 0x1f3   :  { %v1601_v51 = vpop.eup %1600  ;;  %1612 = vtanh.f32 %v358_v47  ;;  %401 = vmatpush.msrb.mxu0 %v1599_v49  ;;  %v56_v49 = vld [vmem:[%s2644_s3 + $0x8] sm:$0xff] }
 0x1f4   :  { %v1603_v2 = vpop.eup %1602  ;;  %430 = vmatpush.msrb.mxu1 %v1601_v51  ;;  %462 = vperm.xlu2 %1548, %v56_v49  }
 0x1f5   :  { %v1605_v57 = vpop.eup %1604  ;;  %402 = vmatpush.msrb.mxu0 %v1603_v2 }
 0x1f6   :  { %v1607_v63 = vpop.eup %1606  ;;  %431 = vmatpush.msrb.mxu1 %v1605_v57  ;;  %v594_v57 = vadd.f32 %v593_v43, %v2218_v19  ;;  %v822_v43 = vmul.f32 %v1978_v21, %v2119_v48 }
 0x1f7   :  { %v1609_v0 = vpop.eup %1608  ;;  %403 = vmatpush.msrb.mxu0 %v1607_v63  ;;  %v623_v63 = vadd.f32 %v622_v44, %v2218_v19 }
 0x1f8   :  { %v1611_v58 = vpop.eup %1610  ;;  %432 = vmatpush.msrb.mxu1 %v1609_v0  ;;  %v2338_v0 = vld [vmem:[#allocation2 + $0x58] sm:$0xff] }
 0x1f9   :  { %v1613_v7 = vpop.eup %1612  ;;  %404 = vmatpush.msrb.mxu0 %v1611_v58  ;;  %v596_v38 = vpop.f32.mrf.mxu2  ;;  %v835_v58 = vmul.f32 %v1976_v20, %v2106_v17  ;;  %v823_v20 = vmul.f32 %v1980_v22, %v2119_v48 }
 0x1fa   :  { %433 = vmatpush.msrb.mxu1 %v1613_v7  ;;  %v625_v39 = vpop.f32.mrf.mxu3  ;;  %1434 = vmatmul.msk.f32.vlgmr.msrb.gmra.mxu0 %vm220_vm0, %v2305_v10  ;;  %v597_v51 = vadd.f32 %v596_v38, %v2212_v40  ;;  %v836_v7 = vmul.f32 %v1985_v24, %v2106_v17 }
 0x1fb   :  { %1438 = vmatmul.msk.f32.vlgmr.msrb.gmra.mxu1 %vm220_vm0, %v2305_v10  ;;  %v626_v2 = vadd.f32 %v625_v39, %v2212_v40  ;;  %v843_v24 = vadd.f32 %v835_v58, %v822_v43 }
 0x1fc   :  { %v844_v21 = vadd.f32 %v836_v7, %v823_v20 }
 0x1fd   :  { %v851_v22 = vadd.f32 %v843_v24, %v2147_v18 }
 0x201   :  { %v599_v35 = vpop.f32.mrf.mxu2 }
 0x202   :  { %v628_v1 = vpop.f32.mrf.mxu3  ;;  %1435 = vmatmul.msk.f32.gmra.mxu0 %vm220_vm0, %v2315_v41  ;;  %v600_v13 = vadd.f32 %v599_v35, %v2210_v23 }
 0x203   :  { %1439 = vmatmul.msk.f32.gmra.mxu1 %vm220_vm0, %v2315_v41  ;;  %v629_v36 = vadd.f32 %v628_v1, %v2210_v23 }
 0x209   :  { %v602_v62 = vpop.f32.mrf.mxu2 }
 0x20a   :  { %v603_v4 = vadd.f32 %v602_v62, %v2205_v37  ;;  %v631_v3 = vpop.f32.mrf.mxu3  ;;  %1436 = vmatmul.msk.f32.gmra.mxu0 %vm220_vm0, %v2321_v61 }
 0x20b   :  { %v632_v47 = vadd.f32 %v631_v3, %v2205_v37  ;;  %1440 = vmatmul.msk.f32.gmra.mxu1 %vm220_vm0, %v2321_v61 }
 0x20c   :  { %1614 = vtanh.f32 %v603_v4 }
 0x20d   :  { %1616 = vtanh.f32 %v632_v47 }
 0x20e   :  { %1618 = vtanh.f32 %v600_v13 }
 0x20f   :  { %1620 = vtanh.f32 %v629_v36 }
 0x210   :  { %1622 = vtanh.f32 %v597_v51 }
 0x211   :  { %1624 = vtanh.f32 %v626_v2  ;;  %v2396_v2 = vpop.permute.xlu2 %116 }
 0x212   :  { %v1615_v38 = vpop.eup %1614  ;;  %1626 = vtanh.f32 %v594_v57  ;;  %1437 = vmatmul.msk.f32.gmra.mxu0 %vm220_vm0, %v2338_v0 }
 0x213   :  { %v1617_v44 = vpop.eup %1616  ;;  %1628 = vtanh.f32 %v623_v63  ;;  %1441 = vmatmul.msk.f32.gmra.mxu1 %vm220_vm0, %v2338_v0  ;;  %654 = vmatpush.msra.mxu0 %v1615_v38  ;;  %v2398_v63 = vpop.permute.xlu1 %120 }
 0x214   :  { %v1619_v39 = vpop.eup %1618  ;;  %1630 = vtanh.f32 %v2047_v5  ;;  %683 = vmatpush.msra.mxu1 %v1617_v44  ;;  %v852_v5 = vadd.f32 %v844_v21, %v2147_v18 }
 0x215   :  { %v1621_v35 = vpop.eup %1620  ;;  %1632 = vtanh.f32 %v2050_v6  ;;  %655 = vmatpush.msra.mxu0 %v1619_v39 }
 0x216   :  { %v1623_v1 = vpop.eup %1622  ;;  %684 = vmatpush.msra.mxu1 %v1621_v35  ;;  %1634 = vtanh.f32 %v2126_v50 }
 0x217   :  { %v1625_v62 = vpop.eup %1624  ;;  %656 = vmatpush.msra.mxu0 %v1623_v1  ;;  %1636 = vtanh.f32 %v2141_v59  ;;  %v58_v59 = vld [vmem:[%s2644_s3 + $0x18] sm:$0xff]  ;;  %v2410_v1 = vpop.permute.xlu0 %128  ;;  %s1874_s3 = smov [#allocation5]  }
 0x218   :  { %v1627_v13 = vpop.eup %1626  ;;  %685 = vmatpush.msra.mxu1 %v1625_v62  ;;  %1638 = vtanh.f32 %v2150_v28  ;;  %472 = vperm.xlu2 %1548, %v58_v59   ;;  %s1396_s10 = sshll.u32 %s1874_s3, 4  ;;  %s1397_s10 = int_to_ptr.vmem [resolvable:$true] %s1396_s10 }
 0x219   :  { %v1629_v6 = vpop.eup %1628  ;;  %657 = vmatpush.msra.mxu0 %v1627_v13  ;;  %1640 = vtanh.f32 %v2153_v30  ;;  %v2401_v38 = vpop.permute.xlu2 %124 }
 0x21a   :  { %v1631_v9 = vpop.eup %1630  ;;  %686 = vmatpush.msra.mxu1 %v1629_v6  ;;  %1453 = vmatmul.msk.f32.vlgmr.msra.gmra.mxu0 %vm220_vm0, %v2237_v45  ;;  %1642 = vtanh.f32 %v851_v22 }
 0x21b   :  { %v1633_v50 = vpop.eup %1632  ;;  %1457 = vmatmul.msk.f32.vlgmr.msra.gmra.mxu1 %vm220_vm0, %v2237_v45  ;;  %879 = vmatpush.msrb.mxu0 %v1631_v9  ;;  %1644 = vtanh.f32 %v852_v5  ;;  %v2408_v21 = vpop.permute.xlu1 %457 }
 0x21c   :  { %v1635_v28 = vpop.eup %1634  ;;  %908 = vmatpush.msrb.mxu1 %v1633_v50  ;;  %2653 = vst [vmem:[#allocation8_spill] sm:$0xff] %v2408_v21 }
 0x21d   :  { %v1637_v30 = vpop.eup %1636  ;;  %880 = vmatpush.msrb.mxu0 %v1635_v28 }
 0x21e   :  { %v1639_v4 = vpop.eup %1638  ;;  %909 = vmatpush.msrb.mxu1 %v1637_v30 }
 0x21f   :  { %v1641_v3 = vpop.eup %1640  ;;  %881 = vmatpush.msrb.mxu0 %v1639_v4 }
 0x220   :  { %v1643_v36 = vpop.eup %1642  ;;  %910 = vmatpush.msrb.mxu1 %v1641_v3 }
 0x221   :  { %v1645_v47 = vpop.eup %1644  ;;  %882 = vmatpush.msrb.mxu0 %v1643_v36 }
 0x222   :  { %911 = vmatpush.msrb.mxu1 %v1645_v47  ;;  %1454 = vmatmul.msk.f32.gmra.mxu0 %vm220_vm0, %v2247_v46 }
 0x223   :  { %1458 = vmatmul.msk.f32.gmra.mxu1 %vm220_vm0, %v2247_v46 }
 0x22a   :  { %1455 = vmatmul.msk.f32.gmra.mxu0 %vm220_vm0, %v2253_v55 }
 0x22b   :  { %1459 = vmatmul.msk.f32.gmra.mxu1 %vm220_vm0, %v2253_v55 }
 0x232   :  { %1456 = vmatmul.msk.f32.gmra.mxu0 %vm220_vm0, %v2259_v29 }
 0x233   :  { %1460 = vmatmul.msk.f32.gmra.mxu1 %vm220_vm0, %v2259_v29 }
 0x23a   :  { %1472 = vmatmul.msk.f32.vlgmr.msrb.gmra.mxu0 %vm220_vm0, %v2181_v15 }
 0x23b   :  { %1476 = vmatmul.msk.f32.vlgmr.msrb.gmra.mxu1 %vm220_vm0, %v2181_v15 }
 0x242   :  { %1473 = vmatmul.msk.f32.gmra.mxu0 %vm220_vm0, %v2187_v54 }
 0x243   :  { %1477 = vmatmul.msk.f32.gmra.mxu1 %vm220_vm0, %v2187_v54 }
 0x24a   :  { %1474 = vmatmul.msk.f32.gmra.mxu0 %vm220_vm0, %v2193_v42 }
 0x24b   :  { %1478 = vmatmul.msk.f32.gmra.mxu1 %vm220_vm0, %v2193_v42 }
 0x24e   :  { %v2412_v62 = vpop.permute.xlu2 %462 }
 0x24f   :  { %2654 = vst [vmem:[#allocation9_spill] sm:$0xff] %v2412_v62 }
 0x252   :  { %1475 = vmatmul.msk.f32.gmra.mxu0 %vm220_vm0, %v2199_v60 }
 0x253   :  { %1479 = vmatmul.msk.f32.gmra.mxu1 %vm220_vm0, %v2199_v60 }
 0x261   :  { %v2416_v4 = vpop.permute.xlu1 %467 }
 0x262   :  { %2655 = vst [vmem:[#allocation10_spill] sm:$0xff] %v2416_v4 }
 0x277   :  { %v406_v49 = vpop.f32.mrf.mxu0 }
 0x278   :  { %v435_v51 = vpop.f32.mrf.mxu1  ;;  %v407_v7 = vadd.f32 %v406_v49, %v2396_v2 }
 0x279   :  { %v436_v43 = vadd.f32 %v435_v51, %v2396_v2 }
 0x27a   :  { %1646 = vtanh.f32 %v407_v7  ;;  %v2424_v7 = vpop.permute.xlu2 %472 }
 0x27b   :  { %1648 = vtanh.f32 %v436_v43 }
 0x27f   :  { %v409_v57 = vpop.f32.mrf.mxu0 }
 0x280   :  { %v438_v58 = vpop.f32.mrf.mxu1  ;;  %v410_v44 = vadd.f32 %v409_v57, %v2398_v63  ;;  %v1647_v22 = vpop.eup %1646 }
 0x281   :  { %v439_v20 = vadd.f32 %v438_v58, %v2398_v63  ;;  %v1649_v5 = vpop.eup %1648  ;;  %v475_v49 = vmul.f32 %v1647_v22, %v2408_v21 }
 0x282   :  { %1650 = vtanh.f32 %v410_v44  ;;  %v476_v57 = vmul.f32 %v1649_v5, %v2408_v21 }
 0x283   :  { %1652 = vtanh.f32 %v439_v20 }
 0x287   :  { %v412_v39 = vpop.f32.mrf.mxu0 }
 0x288   :  { %v413_v24 = vadd.f32 %v412_v39, %v2401_v38  ;;  %v441_v34 = vpop.f32.mrf.mxu1  ;;  %v1651_v6 = vpop.eup %1650 }
 0x289   :  { %v442_v35 = vadd.f32 %v441_v34, %v2401_v38  ;;  %v1653_v59 = vpop.eup %1652  ;;  %v477_v36 = vmul.f32 %v1651_v6, %v2412_v62 }
 0x28a   :  { %1654 = vtanh.f32 %v413_v24  ;;  %v478_v47 = vmul.f32 %v1653_v59, %v2412_v62 }
 0x28b   :  { %1656 = vtanh.f32 %v442_v35  ;;  %v483_v43 = vadd.f32 %v477_v36, %v475_v49 }
 0x28c   :  { %v492_v39 = vadd.f32 %v478_v47, %v476_v57 }
 0x28f   :  { %v415_v13 = vpop.f32.mrf.mxu0 }
 0x290   :  { %v444_v9 = vpop.f32.mrf.mxu1  ;;  %v416_v50 = vadd.f32 %v415_v13, %v2410_v1  ;;  %v1655_v30 = vpop.eup %1654 }
 0x291   :  { %v445_v28 = vadd.f32 %v444_v9, %v2410_v1  ;;  %v1657_v3 = vpop.eup %1656  ;;  %v479_v51 = vmul.f32 %v1655_v30, %v2416_v4 }
 0x292   :  { %1658 = vtanh.f32 %v416_v50  ;;  %v480_v58 = vmul.f32 %v1657_v3, %v2416_v4 }
 0x293   :  { %1660 = vtanh.f32 %v445_v28  ;;  %v484_v35 = vadd.f32 %v483_v43, %v479_v51  ;;  %v2428_v43 = vpop.permute.xlu0 %502 }
 0x294   :  { %v493_v6 = vadd.f32 %v492_v39, %v480_v58 }
 0x297   :  { %v659_v44 = vpop.f32.mrf.mxu0 }
 0x298   :  { %v1659_v20 = vpop.eup %1658  ;;  %v688_v24 = vpop.f32.mrf.mxu1 }
 0x299   :  { %v1661_v34 = vpop.eup %1660  ;;  %v481_v13 = vmul.f32 %v1659_v20, %v2424_v7 }
 0x29a   :  { %v482_v22 = vmul.f32 %v1661_v34, %v2424_v7  ;;  %v513_v34 = vlaneseq }
 0x29b   :  { %v485_v9 = vadd.f32 %v484_v35, %v481_v13 }
 0x29c   :  { %v494_v50 = vadd.f32 %v493_v6, %v482_v22  ;;  %vm2432_vm2 = vcmp.lt.s32.totalorder %v513_v34, 256 }
 0x29d   :  { %v486_v59 = vrot.slane %v485_v9, 4 }
 0x29e   :  { %v495_v5 = vrot.slane %v494_v50, 4 }
 0x29f   :  { %v487_v28 = vadd.f32 %v486_v59, %v485_v9  ;;  %v662_v30 = vpop.f32.mrf.mxu0 }
 0x2a0   :  { %v496_v3 = vadd.f32 %v495_v5, %v494_v50  ;;  %v691_v4 = vpop.f32.mrf.mxu1 }
 0x2a1   :  { %v488_v36 = vrot.slane %v487_v28, 2 }
 0x2a2   :  { %v497_v49 = vrot.slane %v496_v3, 2 }
 0x2a3   :  { %v489_v21 = vadd.f32 %v488_v36, %v487_v28  ;;  %v692_v36 = vadd.f32 %v691_v4, %v2288_v27 }
 0x2a4   :  { %v498_v47 = vadd.f32 %v497_v49, %v496_v3  ;;  %v663_v3 = vadd.f32 %v662_v30, %v2288_v27  ;;  %v660_v49 = vadd.f32 %v659_v44, %v2294_v8 }
 0x2a5   :  { %v490_v57 = vrot.slane %v489_v21, 1 }
 0x2a6   :  { %v499_v62 = vrot.slane %v498_v47, 1 }
 0x2a7   :  { %v665_v51 = vpop.f32.mrf.mxu0  ;;  %v491_v20 = vadd.f32 %v490_v57, %v489_v21 }
 0x2a8   :  { %v694_v58 = vpop.f32.mrf.mxu1  ;;  %v500_v39 = vadd.f32 %v499_v62, %v498_v47  ;;  %v666_v21 = vadd.f32 %v665_v51, %v2284_v16  ;;  %v689_v47 = vadd.f32 %v688_v24, %v2294_v8 }
 0x2a9   :  { %v505_v13 = vadd.f32 %v2428_v43, %v491_v20  ;;  %v695_v5 = vadd.f32 %v694_v58, %v2284_v16 }
 0x2aa   :  { %v506_v35 = vadd.f32 %v2428_v43, %v500_v39 }
 0x2ac   :  { %v509_v6 = vrot.slane %v506_v35, 7 }
 0x2ae   :  { %v511_v9 = vsel %vm510_vm1, %v505_v13, %v509_v6 }
 0x2af   :  { %v668_v50 = vpop.f32.mrf.mxu0  ;;  %517 = vst.msk [vmem:[#allocation5] sm:$0x3] %vm2432_vm2, %v511_v9 }
 0x2b0   :  { %v669_v62 = vadd.f32 %v668_v50, %v2281_v31  ;;  %v697_v59 = vpop.f32.mrf.mxu1 }
 0x2b1   :  { %v698_v28 = vadd.f32 %v697_v59, %v2281_v31 }
 0x2b2   :  { %1662 = vtanh.f32 %v669_v62 }
 0x2b3   :  { %1664 = vtanh.f32 %v698_v28 }
 0x2b4   :  { %1666 = vtanh.f32 %v666_v21 }
 0x2b5   :  { %1668 = vtanh.f32 %v695_v5 }
 0x2b6   :  { %1670 = vtanh.f32 %v663_v3 }
 0x2b7   :  { %1672 = vtanh.f32 %v692_v36  ;;  %v884_v57 = vpop.f32.mrf.mxu0 }
 0x2b8   :  { %v1663_v51 = vpop.eup %1662  ;;  %1674 = vtanh.f32 %v660_v49  ;;  %v913_v58 = vpop.f32.mrf.mxu1  ;;  %v885_v49 = vadd.f32 %v884_v57, %v2218_v19  ;;  %v1113_v57 = vmul.f32 %v2002_v32, %v2119_v48 }
 0x2b9   :  { %v1665_v20 = vpop.eup %1664  ;;  %1676 = vtanh.f32 %v689_v47  ;;  %720 = vmatpush.msra.mxu2 %v1663_v51  ;;  %v914_v47 = vadd.f32 %v913_v58, %v2218_v19  ;;  %v1126_v51 = vmul.f32 %v1987_v25, %v2106_v17  ;;  %v1114_v25 = vmul.f32 %v2004_v33, %v2119_v48 }
 0x2ba   :  { %v1667_v30 = vpop.eup %1666  ;;  %749 = vmatpush.msra.mxu3 %v1665_v20  ;;  %v1127_v20 = vmul.f32 %v1989_v26, %v2106_v17 }
 0x2bb   :  { %v1669_v39 = vpop.eup %1668  ;;  %721 = vmatpush.msra.mxu2 %v1667_v30  ;;  %v1134_v26 = vadd.f32 %v1126_v51, %v1113_v57 }
 0x2bc   :  { %v1671_v4 = vpop.eup %1670  ;;  %750 = vmatpush.msra.mxu3 %v1669_v39 }
 0x2bd   :  { %v1673_v44 = vpop.eup %1672  ;;  %722 = vmatpush.msra.mxu2 %v1671_v4  ;;  %v1135_v4 = vadd.f32 %v1127_v20, %v1114_v25  ;;  %v2658_v20 = vld [vmem:[#allocation9_spill] sm:$0xff] }
 0x2be   :  { %v1675_v34 = vpop.eup %1674  ;;  %751 = vmatpush.msra.mxu3 %v1673_v44  ;;  %v1142_v44 = vadd.f32 %v1134_v26, %v2147_v18 }
 0x2bf   :  { %v1677_v24 = vpop.eup %1676  ;;  %723 = vmatpush.msra.mxu2 %v1675_v34  ;;  %v887_v35 = vpop.f32.mrf.mxu0  ;;  %v1143_v33 = vadd.f32 %v1135_v4, %v2147_v18 }
 0x2c0   :  { %752 = vmatpush.msra.mxu3 %v1677_v24  ;;  %v916_v13 = vpop.f32.mrf.mxu1  ;;  %1461 = vmatmul.msk.f32.vlgmr.msra.gmra.mxu2 %vm220_vm0, %v2305_v10  ;;  %v888_v3 = vadd.f32 %v887_v35, %v2212_v40 }
 0x2c1   :  { %1465 = vmatmul.msk.f32.vlgmr.msra.gmra.mxu3 %vm220_vm0, %v2305_v10  ;;  %v917_v36 = vadd.f32 %v916_v13, %v2212_v40 }
 0x2c7   :  { %v890_v6 = vpop.f32.mrf.mxu0 }
 0x2c8   :  { %v919_v9 = vpop.f32.mrf.mxu1  ;;  %1462 = vmatmul.msk.f32.gmra.mxu2 %vm220_vm0, %v2315_v41  ;;  %v891_v21 = vadd.f32 %v890_v6, %v2210_v23 }
 0x2c9   :  { %1466 = vmatmul.msk.f32.gmra.mxu3 %vm220_vm0, %v2315_v41  ;;  %v920_v5 = vadd.f32 %v919_v9, %v2210_v23 }
 0x2cf   :  { %v893_v50 = vpop.f32.mrf.mxu0 }
 0x2d0   :  { %v894_v62 = vadd.f32 %v893_v50, %v2205_v37  ;;  %v922_v59 = vpop.f32.mrf.mxu1  ;;  %1463 = vmatmul.msk.f32.gmra.mxu2 %vm220_vm0, %v2321_v61 }
 0x2d1   :  { %v923_v28 = vadd.f32 %v922_v59, %v2205_v37  ;;  %1467 = vmatmul.msk.f32.gmra.mxu3 %vm220_vm0, %v2321_v61 }
 0x2d2   :  { %1678 = vtanh.f32 %v894_v62 }
 0x2d3   :  { %1680 = vtanh.f32 %v923_v28 }
 0x2d4   :  { %1682 = vtanh.f32 %v891_v21 }
 0x2d5   :  { %1684 = vtanh.f32 %v920_v5 }
 0x2d6   :  { %1686 = vtanh.f32 %v888_v3 }
 0x2d7   :  { %1688 = vtanh.f32 %v917_v36 }
 0x2d8   :  { %v1679_v30 = vpop.eup %1678  ;;  %1690 = vtanh.f32 %v885_v49  ;;  %1464 = vmatmul.msk.f32.gmra.mxu2 %vm220_vm0, %v2338_v0 }
 0x2d9   :  { %v1681_v39 = vpop.eup %1680  ;;  %1692 = vtanh.f32 %v914_v47  ;;  %1468 = vmatmul.msk.f32.gmra.mxu3 %vm220_vm0, %v2338_v0  ;;  %945 = vmatpush.msrb.mxu2 %v1679_v30 }
 0x2da   :  { %v1683_v58 = vpop.eup %1682  ;;  %1694 = vtanh.f32 %v2053_v12  ;;  %974 = vmatpush.msrb.mxu3 %v1681_v39  ;;  %v2659_v39 = vld [vmem:[#allocation8_spill] sm:$0xff] }
 0x2db   :  { %v1685_v17 = vpop.eup %1684  ;;  %1696 = vtanh.f32 %v2056_v14  ;;  %946 = vmatpush.msrb.mxu2 %v1683_v58  ;;  %v2660_v58 = vld [vmem:[#allocation10_spill] sm:$0xff] }
 0x2dc   :  { %v1687_v32 = vpop.eup %1686  ;;  %975 = vmatpush.msrb.mxu3 %v1685_v17  ;;  %1698 = vtanh.f32 %v2170_v52 }
 0x2dd   :  { %v1689_v34 = vpop.eup %1688  ;;  %947 = vmatpush.msrb.mxu2 %v1687_v32  ;;  %1700 = vtanh.f32 %v2173_v53 }
 0x2de   :  { %v1691_v12 = vpop.eup %1690  ;;  %976 = vmatpush.msrb.mxu3 %v1689_v34  ;;  %1702 = vtanh.f32 %v2176_v11 }
 0x2df   :  { %v1693_v48 = vpop.eup %1692  ;;  %948 = vmatpush.msrb.mxu2 %v1691_v12  ;;  %1704 = vtanh.f32 %v2179_v56 }
 0x2e0   :  { %v1695_v14 = vpop.eup %1694  ;;  %977 = vmatpush.msrb.mxu3 %v1693_v48  ;;  %1480 = vmatmul.msk.f32.vlgmr.msrb.gmra.mxu2 %vm220_vm0, %v2237_v45  ;;  %1706 = vtanh.f32 %v1142_v44 }
 0x2e1   :  { %v1697_v52 = vpop.eup %1696  ;;  %1484 = vmatmul.msk.f32.vlgmr.msrb.gmra.mxu3 %vm220_vm0, %v2237_v45  ;;  %1170 = vmatpush.msra.mxu2 %v1695_v14  ;;  %1708 = vtanh.f32 %v1143_v33 }
 0x2e2   :  { %v1699_v18 = vpop.eup %1698  ;;  %1199 = vmatpush.msra.mxu3 %v1697_v52 }
 0x2e3   :  { %v1701_v53 = vpop.eup %1700  ;;  %1171 = vmatpush.msra.mxu2 %v1699_v18 }
 0x2e4   :  { %v1703_v11 = vpop.eup %1702  ;;  %1200 = vmatpush.msra.mxu3 %v1701_v53 }
 0x2e5   :  { %v1705_v24 = vpop.eup %1704  ;;  %1172 = vmatpush.msra.mxu2 %v1703_v11 }
 0x2e6   :  { %v1707_v56 = vpop.eup %1706  ;;  %1201 = vmatpush.msra.mxu3 %v1705_v24 }
 0x2e7   :  { %v1709_v35 = vpop.eup %1708  ;;  %1173 = vmatpush.msra.mxu2 %v1707_v56 }
 0x2e8   :  { %1202 = vmatpush.msra.mxu3 %v1709_v35  ;;  %1481 = vmatmul.msk.f32.gmra.mxu2 %vm220_vm0, %v2247_v46 }
 0x2e9   :  { %1485 = vmatmul.msk.f32.gmra.mxu3 %vm220_vm0, %v2247_v46 }
 0x2f0   :  { %1482 = vmatmul.msk.f32.gmra.mxu2 %vm220_vm0, %v2253_v55 }
 0x2f1   :  { %1486 = vmatmul.msk.f32.gmra.mxu3 %vm220_vm0, %v2253_v55 }
 0x2f8   :  { %1483 = vmatmul.msk.f32.gmra.mxu2 %vm220_vm0, %v2259_v29 }
 0x2f9   :  { %1487 = vmatmul.msk.f32.gmra.mxu3 %vm220_vm0, %v2259_v29 }
 0x300   :  { %1499 = vmatmul.msk.f32.vlgmr.msra.gmra.mxu2 %vm220_vm0, %v2181_v15 }
 0x301   :  { %1503 = vmatmul.msk.f32.vlgmr.msra.gmra.mxu3 %vm220_vm0, %v2181_v15 }
 0x308   :  { %1500 = vmatmul.msk.f32.gmra.mxu2 %vm220_vm0, %v2187_v54 }
 0x309   :  { %1504 = vmatmul.msk.f32.gmra.mxu3 %vm220_vm0, %v2187_v54 }
 0x310   :  { %1501 = vmatmul.msk.f32.gmra.mxu2 %vm220_vm0, %v2193_v42 }
 0x311   :  { %1505 = vmatmul.msk.f32.gmra.mxu3 %vm220_vm0, %v2193_v42 }
 0x318   :  { %1502 = vmatmul.msk.f32.gmra.mxu2 %vm220_vm0, %v2199_v60 }
 0x319   :  { %1506 = vmatmul.msk.f32.gmra.mxu3 %vm220_vm0, %v2199_v60 }
 0x343   :  { %v725_v45 = vpop.f32.mrf.mxu2 }
 0x344   :  { %v754_v15 = vpop.f32.mrf.mxu3  ;;  %v726_v29 = vadd.f32 %v725_v45, %v2396_v2 }
 0x345   :  { %v755_v54 = vadd.f32 %v754_v15, %v2396_v2 }
 0x346   :  { %1710 = vtanh.f32 %v726_v29 }
 0x347   :  { %1712 = vtanh.f32 %v755_v54 }
 0x34b   :  { %v728_v46 = vpop.f32.mrf.mxu2 }
 0x34c   :  { %v757_v55 = vpop.f32.mrf.mxu3  ;;  %v729_v13 = vadd.f32 %v728_v46, %v2398_v63  ;;  %v1711_v21 = vpop.eup %1710 }
 0x34d   :  { %v758_v6 = vadd.f32 %v757_v55, %v2398_v63  ;;  %v1713_v62 = vpop.eup %1712  ;;  %v774_v25 = vmul.f32 %v1711_v21, %v2659_v39 }
 0x34e   :  { %1714 = vtanh.f32 %v729_v13  ;;  %v775_v17 = vmul.f32 %v1713_v62, %v2659_v39 }
 0x34f   :  { %1716 = vtanh.f32 %v758_v6 }
 0x353   :  { %v731_v9 = vpop.f32.mrf.mxu2 }
 0x354   :  { %v732_v42 = vadd.f32 %v731_v9, %v2401_v38  ;;  %v760_v50 = vpop.f32.mrf.mxu3  ;;  %v1715_v5 = vpop.eup %1714 }
 0x355   :  { %v761_v60 = vadd.f32 %v760_v50, %v2401_v38  ;;  %v1717_v36 = vpop.eup %1716  ;;  %v776_v30 = vmul.f32 %v1715_v5, %v2658_v20 }
 0x356   :  { %1718 = vtanh.f32 %v732_v42  ;;  %v777_v57 = vmul.f32 %v1717_v36, %v2658_v20 }
 0x357   :  { %1720 = vtanh.f32 %v761_v60  ;;  %v782_v32 = vadd.f32 %v776_v30, %v774_v25 }
 0x358   :  { %v791_v33 = vadd.f32 %v777_v57, %v775_v17 }
 0x35b   :  { %v734_v59 = vpop.f32.mrf.mxu2 }
 0x35c   :  { %v735_v28 = vadd.f32 %v734_v59, %v2410_v1  ;;  %v763_v3 = vpop.f32.mrf.mxu3  ;;  %v1719_v47 = vpop.eup %1718 }
 0x35d   :  { %v764_v49 = vadd.f32 %v763_v3, %v2410_v1  ;;  %v1721_v51 = vpop.eup %1720  ;;  %v778_v26 = vmul.f32 %v1719_v47, %v2660_v58 }
 0x35e   :  { %1722 = vtanh.f32 %v735_v28  ;;  %v779_v4 = vmul.f32 %v1721_v51, %v2660_v58 }
 0x35f   :  { %1724 = vtanh.f32 %v764_v49  ;;  %v783_v14 = vadd.f32 %v782_v32, %v778_v26 }
 0x360   :  { %v792_v18 = vadd.f32 %v791_v33, %v779_v4 }
 0x363   :  { %v950_v44 = vpop.f32.mrf.mxu2 }
 0x364   :  { %v1723_v34 = vpop.eup %1722  ;;  %v979_v12 = vpop.f32.mrf.mxu3  ;;  %v951_v17 = vadd.f32 %v950_v44, %v2294_v8 }
 0x365   :  { %v1725_v48 = vpop.eup %1724  ;;  %v780_v52 = vmul.f32 %v1723_v34, %v2424_v7  ;;  %v980_v4 = vadd.f32 %v979_v12, %v2294_v8 }
 0x366   :  { %v781_v53 = vmul.f32 %v1725_v48, %v2424_v7 }
 0x367   :  { %v784_v11 = vadd.f32 %v783_v14, %v780_v52 }
 0x368   :  { %v793_v24 = vadd.f32 %v792_v18, %v781_v53 }
 0x369   :  { %v785_v56 = vrot.slane %v784_v11, 4 }
 0x36a   :  { %v794_v35 = vrot.slane %v793_v24, 4 }
 0x36b   :  { %v786_v45 = vadd.f32 %v785_v56, %v784_v11  ;;  %v953_v15 = vpop.f32.mrf.mxu2 }
 0x36c   :  { %v795_v46 = vadd.f32 %v794_v35, %v793_v24  ;;  %v982_v55 = vpop.f32.mrf.mxu3  ;;  %v954_v25 = vadd.f32 %v953_v15, %v2288_v27 }
 0x36d   :  { %v787_v29 = vrot.slane %v786_v45, 2  ;;  %v983_v26 = vadd.f32 %v982_v55, %v2288_v27 }
 0x36e   :  { %v796_v54 = vrot.slane %v795_v46, 2 }
 0x36f   :  { %v788_v13 = vadd.f32 %v787_v29, %v786_v45 }
 0x370   :  { %v797_v6 = vadd.f32 %v796_v54, %v795_v46 }
 0x371   :  { %v789_v9 = vrot.slane %v788_v13, 1 }
 0x372   :  { %v798_v42 = vrot.slane %v797_v6, 1 }
 0x373   :  { %v956_v50 = vpop.f32.mrf.mxu2  ;;  %v790_v60 = vadd.f32 %v789_v9, %v788_v13 }
 0x374   :  { %v799_v21 = vadd.f32 %v798_v42, %v797_v6  ;;  %v985_v62 = vpop.f32.mrf.mxu3  ;;  %v957_v49 = vadd.f32 %v956_v50, %v2284_v16 }
 0x375   :  { %v800_v5 = vadd.f32 %v790_v60, %v2428_v43  ;;  %v986_v30 = vadd.f32 %v985_v62, %v2284_v16  ;;  %v1806_v60 = vld [vmem:[#allocation2 + $0x20] sm:$0xff]  ;;  %v1809_v62 = vld [vmem:[#allocation2 + $0x38] sm:$0xff] }
 0x376   :  { %v801_v59 = vadd.f32 %v799_v21, %v2428_v43  ;;  %v1808_v21 = vld [vmem:[#allocation2 + $0x30] sm:$0xff] }
 0x378   :  { %v804_v28 = vrot.slane %v801_v59, 7 }
 0x37a   :  { %v805_v3 = vsel %vm510_vm1, %v800_v5, %v804_v28 }
 0x37b   :  { %v959_v36 = vpop.f32.mrf.mxu2  ;;  %808 = vst.msk [vmem:[#allocation5 + $0x2] sm:$0x3] %vm2432_vm2, %v805_v3 }
 0x37c   :  { %v960_v47 = vadd.f32 %v959_v36, %v2281_v31  ;;  %v988_v51 = vpop.f32.mrf.mxu3 }
 0x37d   :  { %v989_v57 = vadd.f32 %v988_v51, %v2281_v31 }
 0x37e   :  { %1726 = vtanh.f32 %v960_v47 }
 0x37f   :  { %1728 = vtanh.f32 %v989_v57 }
 0x380   :  { %1730 = vtanh.f32 %v957_v49 }
 0x381   :  { %1732 = vtanh.f32 %v986_v30 }
 0x382   :  { %1734 = vtanh.f32 %v954_v25 }
 0x383   :  { %1736 = vtanh.f32 %v983_v26  ;;  %v1175_v32 = vpop.f32.mrf.mxu2 }
 0x384   :  { %v1727_v34 = vpop.eup %1726  ;;  %1738 = vtanh.f32 %v951_v17  ;;  %v1204_v33 = vpop.f32.mrf.mxu3  ;;  %v1176_v13 = vadd.f32 %v1175_v32, %v2218_v19 }
 0x385   :  { %v1729_v48 = vpop.eup %1728  ;;  %1740 = vtanh.f32 %v980_v4  ;;  %1011 = vmatpush.msra.mxu0 %v1727_v34  ;;  %v1205_v6 = vadd.f32 %v1204_v33, %v2218_v19 }
 0x386   :  { %v1731_v14 = vpop.eup %1730  ;;  %1040 = vmatpush.msra.mxu1 %v1729_v48 }
 0x387   :  { %v1733_v52 = vpop.eup %1732  ;;  %1012 = vmatpush.msra.mxu0 %v1731_v14 }
 0x388   :  { %v1735_v18 = vpop.eup %1734  ;;  %1041 = vmatpush.msra.mxu1 %v1733_v52 }
 0x389   :  { %v1737_v44 = vpop.eup %1736  ;;  %1013 = vmatpush.msra.mxu0 %v1735_v18 }
 0x38a   :  { %v1739_v53 = vpop.eup %1738  ;;  %1042 = vmatpush.msra.mxu1 %v1737_v44 }
 0x38b   :  { %v1741_v12 = vpop.eup %1740  ;;  %1014 = vmatpush.msra.mxu0 %v1739_v53  ;;  %v1178_v11 = vpop.f32.mrf.mxu2 }
 0x38c   :  { %1043 = vmatpush.msra.mxu1 %v1741_v12  ;;  %v1207_v24 = vpop.f32.mrf.mxu3  ;;  %1488 = vmatmul.msk.f32.vlgmr.msra.gmra.mxu0 %vm220_vm0, %v2305_v10  ;;  %v1179_v54 = vadd.f32 %v1178_v11, %v2212_v40 }
 0x38d   :  { %1492 = vmatmul.msk.f32.vlgmr.msra.gmra.mxu1 %vm220_vm0, %v2305_v10 }
 0x393   :  { %v1181_v56 = vpop.f32.mrf.mxu2 }
 0x394   :  { %v1210_v35 = vpop.f32.mrf.mxu3  ;;  %1489 = vmatmul.msk.f32.gmra.mxu0 %vm220_vm0, %v2315_v41  ;;  %v1182_v15 = vadd.f32 %v1181_v56, %v2210_v23 }
 0x395   :  { %1493 = vmatmul.msk.f32.gmra.mxu1 %vm220_vm0, %v2315_v41  ;;  %v1211_v29 = vadd.f32 %v1210_v35, %v2210_v23  ;;  %v1208_v41 = vadd.f32 %v1207_v24, %v2212_v40 }
 0x39b   :  { %v1184_v45 = vpop.f32.mrf.mxu2 }
 0x39c   :  { %v1185_v46 = vadd.f32 %v1184_v45, %v2205_v37  ;;  %v1213_v55 = vpop.f32.mrf.mxu3  ;;  %1490 = vmatmul.msk.f32.gmra.mxu0 %vm220_vm0, %v2321_v61 }
 0x39d   :  { %v1214_v10 = vadd.f32 %v1213_v55, %v2205_v37  ;;  %1494 = vmatmul.msk.f32.gmra.mxu1 %vm220_vm0, %v2321_v61 }
 0x39e   :  { %1742 = vtanh.f32 %v1185_v46 }
 0x39f   :  { %1744 = vtanh.f32 %v1214_v10 }
 0x3a0   :  { %1746 = vtanh.f32 %v1182_v15 }
 0x3a1   :  { %1748 = vtanh.f32 %v1211_v29 }
 0x3a2   :  { %1750 = vtanh.f32 %v1179_v54 }
 0x3a3   :  { %1752 = vtanh.f32 %v1208_v41 }
 0x3a4   :  { %v1743_v23 = vpop.eup %1742  ;;  %1754 = vtanh.f32 %v1176_v13  ;;  %1491 = vmatmul.msk.f32.gmra.mxu0 %vm220_vm0, %v2338_v0 }
 0x3a5   :  { %v1745_v37 = vpop.eup %1744  ;;  %1756 = vtanh.f32 %v1205_v6  ;;  %1495 = vmatmul.msk.f32.gmra.mxu1 %vm220_vm0, %v2338_v0  ;;  %1236 = vmatpush.msrb.mxu0 %v1743_v23  ;;  %v1807_v0 = vld [vmem:[#allocation2 + $0x28] sm:$0xff] }
 0x3a6   :  { %v1747_v40 = vpop.eup %1746  ;;  %1265 = vmatpush.msrb.mxu1 %v1745_v37 }
 0x3a7   :  { %v1749_v61 = vpop.eup %1748  ;;  %1237 = vmatpush.msrb.mxu0 %v1747_v40 }
 0x3a8   :  { %v1751_v9 = vpop.eup %1750  ;;  %1266 = vmatpush.msrb.mxu1 %v1749_v61 }
 0x3a9   :  { %v1753_v19 = vpop.eup %1752  ;;  %1238 = vmatpush.msrb.mxu0 %v1751_v9 }
 0x3aa   :  { %v1755_v42 = vpop.eup %1754  ;;  %1267 = vmatpush.msrb.mxu1 %v1753_v19 }
 0x3ab   :  { %v1757_v50 = vpop.eup %1756  ;;  %1239 = vmatpush.msrb.mxu0 %v1755_v42 }
 0x3ac   :  { %1268 = vmatpush.msrb.mxu1 %v1757_v50  ;;  %1507 = vmatmul.msk.f32.vlgmr.msrb.gmra.mxu0 %vm220_vm0, %v1806_v60 }
 0x3ad   :  { %1511 = vmatmul.msk.f32.vlgmr.msrb.gmra.mxu1 %vm220_vm0, %v1806_v60 }
 0x3b4   :  { %1508 = vmatmul.msk.f32.gmra.mxu0 %vm220_vm0, %v1807_v0 }
 0x3b5   :  { %1512 = vmatmul.msk.f32.gmra.mxu1 %vm220_vm0, %v1807_v0 }
 0x3bc   :  { %1509 = vmatmul.msk.f32.gmra.mxu0 %vm220_vm0, %v1808_v21 }
 0x3bd   :  { %1513 = vmatmul.msk.f32.gmra.mxu1 %vm220_vm0, %v1808_v21 }
 0x3c4   :  { %1510 = vmatmul.msk.f32.gmra.mxu0 %vm220_vm0, %v1809_v62 }
 0x3c5   :  { %1514 = vmatmul.msk.f32.gmra.mxu1 %vm220_vm0, %v1809_v62 }
 0x409   :  { %v1016_v59 = vpop.f32.mrf.mxu0 }
 0x40a   :  { %v1045_v5 = vpop.f32.mrf.mxu1  ;;  %v1017_v36 = vadd.f32 %v1016_v59, %v2396_v2 }
 0x40b   :  { %v1046_v49 = vadd.f32 %v1045_v5, %v2396_v2 }
 0x40c   :  { %1758 = vtanh.f32 %v1017_v36 }
 0x40d   :  { %1760 = vtanh.f32 %v1046_v49 }
 0x411   :  { %v1019_v28 = vpop.f32.mrf.mxu0 }
 0x412   :  { %v1048_v3 = vpop.f32.mrf.mxu1  ;;  %v1020_v47 = vadd.f32 %v1019_v28, %v2398_v63  ;;  %v1759_v17 = vpop.eup %1758 }
 0x413   :  { %v1049_v51 = vadd.f32 %v1048_v3, %v2398_v63  ;;  %v1761_v4 = vpop.eup %1760  ;;  %v1065_v11 = vmul.f32 %v1759_v17, %v2659_v39 }
 0x414   :  { %1762 = vtanh.f32 %v1020_v47  ;;  %v1066_v56 = vmul.f32 %v1761_v4, %v2659_v39 }
 0x415   :  { %1764 = vtanh.f32 %v1049_v51 }
 0x419   :  { %v1022_v30 = vpop.f32.mrf.mxu0 }
 0x41a   :  { %v1023_v57 = vadd.f32 %v1022_v30, %v2401_v38  ;;  %v1051_v25 = vpop.f32.mrf.mxu1  ;;  %v1763_v34 = vpop.eup %1762 }
 0x41b   :  { %v1052_v26 = vadd.f32 %v1051_v25, %v2401_v38  ;;  %v1765_v14 = vpop.eup %1764  ;;  %v1067_v53 = vmul.f32 %v1763_v34, %v2658_v20 }
 0x41c   :  { %1766 = vtanh.f32 %v1023_v57  ;;  %v1068_v12 = vmul.f32 %v1765_v14, %v2658_v20 }
 0x41d   :  { %1768 = vtanh.f32 %v1052_v26  ;;  %v1073_v45 = vadd.f32 %v1067_v53, %v1065_v11 }
 0x41e   :  { %v1082_v55 = vadd.f32 %v1068_v12, %v1066_v56  ;;  %v1812_v56 = vld [vmem:[#allocation2 + $0x50] sm:$0xff] }
 0x421   :  { %v1025_v32 = vpop.f32.mrf.mxu0 }
 0x422   :  { %v1026_v33 = vadd.f32 %v1025_v32, %v2410_v1  ;;  %v1054_v48 = vpop.f32.mrf.mxu1  ;;  %v1767_v18 = vpop.eup %1766 }
 0x423   :  { %v1055_v52 = vadd.f32 %v1054_v48, %v2410_v1  ;;  %v1769_v44 = vpop.eup %1768  ;;  %v1069_v24 = vmul.f32 %v1767_v18, %v2660_v58 }
 0x424   :  { %1770 = vtanh.f32 %v1026_v33  ;;  %v1070_v35 = vmul.f32 %v1769_v44, %v2660_v58 }
 0x425   :  { %1772 = vtanh.f32 %v1055_v52  ;;  %v1074_v54 = vadd.f32 %v1073_v45, %v1069_v24  ;;  %v1811_v24 = vld [vmem:[#allocation2 + $0x48] sm:$0xff] }
 0x426   :  { %v1083_v13 = vadd.f32 %v1082_v55, %v1070_v35  ;;  %v1813_v35 = vld [vmem:[#allocation2 + $0x58] sm:$0xff] }
 0x429   :  { %v1241_v15 = vpop.f32.mrf.mxu0 }
 0x42a   :  { %v1771_v46 = vpop.eup %1770  ;;  %v1270_v29 = vpop.f32.mrf.mxu1  ;;  %v1242_v14 = vadd.f32 %v1241_v15, %v2294_v8 }
 0x42b   :  { %v1773_v10 = vpop.eup %1772  ;;  %v1071_v41 = vmul.f32 %v1771_v46, %v2424_v7  ;;  %v1271_v52 = vadd.f32 %v1270_v29, %v2294_v8  ;;  %v1810_v8 = vld [vmem:[#allocation2 + $0x40] sm:$0xff] }
 0x42c   :  { %v1072_v6 = vmul.f32 %v1773_v10, %v2424_v7 }
 0x42d   :  { %v1075_v23 = vadd.f32 %v1074_v54, %v1071_v41 }
 0x42e   :  { %v1084_v37 = vadd.f32 %v1083_v13, %v1072_v6 }
 0x42f   :  { %v1076_v40 = vrot.slane %v1075_v23, 4 }
 0x430   :  { %v1085_v61 = vrot.slane %v1084_v37, 4 }
 0x431   :  { %v1077_v9 = vadd.f32 %v1076_v40, %v1075_v23  ;;  %v1244_v19 = vpop.f32.mrf.mxu0 }
 0x432   :  { %v1086_v42 = vadd.f32 %v1085_v61, %v1084_v37  ;;  %v1273_v50 = vpop.f32.mrf.mxu1  ;;  %v1245_v33 = vadd.f32 %v1244_v19, %v2288_v27 }
 0x433   :  { %v1078_v60 = vrot.slane %v1077_v9, 2  ;;  %v1274_v48 = vadd.f32 %v1273_v50, %v2288_v27 }
 0x434   :  { %v1087_v0 = vrot.slane %v1086_v42, 2 }
 0x435   :  { %v1079_v21 = vadd.f32 %v1078_v60, %v1077_v9 }
 0x436   :  { %v1088_v62 = vadd.f32 %v1087_v0, %v1086_v42 }
 0x437   :  { %v1080_v59 = vrot.slane %v1079_v21, 1 }
 0x438   :  { %v1089_v5 = vrot.slane %v1088_v62, 1 }
 0x439   :  { %v1247_v28 = vpop.f32.mrf.mxu0  ;;  %v1081_v3 = vadd.f32 %v1080_v59, %v1079_v21 }
 0x43a   :  { %v1090_v36 = vadd.f32 %v1089_v5, %v1088_v62  ;;  %v1276_v49 = vpop.f32.mrf.mxu1  ;;  %v1248_v26 = vadd.f32 %v1247_v28, %v2284_v16 }
 0x43b   :  { %v1091_v51 = vadd.f32 %v1081_v3, %v2428_v43  ;;  %v1277_v32 = vadd.f32 %v1276_v49, %v2284_v16 }
 0x43c   :  { %v1092_v47 = vadd.f32 %v1090_v36, %v2428_v43 }
 0x43e   :  { %v1095_v30 = vrot.slane %v1092_v47, 7 }
 0x440   :  { %v1096_v57 = vsel %vm510_vm1, %v1091_v51, %v1095_v30 }
 0x441   :  { %v1250_v25 = vpop.f32.mrf.mxu0  ;;  %1099 = vst.msk [vmem:[#allocation5 + $0x4] sm:$0x3] %vm2432_vm2, %v1096_v57 }
 0x442   :  { %v1251_v17 = vadd.f32 %v1250_v25, %v2281_v31  ;;  %v1279_v4 = vpop.f32.mrf.mxu1 }
 0x443   :  { %v1280_v34 = vadd.f32 %v1279_v4, %v2281_v31 }
 0x444   :  { %1774 = vtanh.f32 %v1251_v17 }
 0x445   :  { %1776 = vtanh.f32 %v1280_v34 }
 0x446   :  { %1778 = vtanh.f32 %v1248_v26 }
 0x447   :  { %1780 = vtanh.f32 %v1277_v32 }
 0x448   :  { %1782 = vtanh.f32 %v1245_v33 }
 0x449   :  { %1784 = vtanh.f32 %v1274_v48 }
 0x44a   :  { %v1775_v18 = vpop.eup %1774  ;;  %1786 = vtanh.f32 %v1242_v14 }
 0x44b   :  { %v1777_v44 = vpop.eup %1776  ;;  %1788 = vtanh.f32 %v1271_v52  ;;  %1302 = vmatpush.msrb.mxu2 %v1775_v18 }
 0x44c   :  { %v1779_v31 = vpop.eup %1778  ;;  %1331 = vmatpush.msrb.mxu3 %v1777_v44 }
 0x44d   :  { %v1781_v16 = vpop.eup %1780  ;;  %1303 = vmatpush.msrb.mxu2 %v1779_v31 }
 0x44e   :  { %v1783_v53 = vpop.eup %1782  ;;  %1332 = vmatpush.msrb.mxu3 %v1781_v16 }
 0x44f   :  { %v1785_v27 = vpop.eup %1784  ;;  %1304 = vmatpush.msrb.mxu2 %v1783_v53 }
 0x450   :  { %v1787_v12 = vpop.eup %1786  ;;  %1333 = vmatpush.msrb.mxu3 %v1785_v27 }
 0x451   :  { %v1789_v11 = vpop.eup %1788  ;;  %1305 = vmatpush.msrb.mxu2 %v1787_v12 }
 0x452   :  { %1334 = vmatpush.msrb.mxu3 %v1789_v11  ;;  %1515 = vmatmul.msk.f32.vlgmr.msrb.gmra.mxu2 %vm220_vm0, %v1810_v8 }
 0x453   :  { %1519 = vmatmul.msk.f32.vlgmr.msrb.gmra.mxu3 %vm220_vm0, %v1810_v8 }
 0x45a   :  { %1516 = vmatmul.msk.f32.gmra.mxu2 %vm220_vm0, %v1811_v24 }
 0x45b   :  { %1520 = vmatmul.msk.f32.gmra.mxu3 %vm220_vm0, %v1811_v24 }
 0x462   :  { %1517 = vmatmul.msk.f32.gmra.mxu2 %vm220_vm0, %v1812_v56 }
 0x463   :  { %1521 = vmatmul.msk.f32.gmra.mxu3 %vm220_vm0, %v1812_v56 }
 0x46a   :  { %1518 = vmatmul.msk.f32.gmra.mxu2 %vm220_vm0, %v1813_v35 }
 0x46b   :  { %1522 = vmatmul.msk.f32.gmra.mxu3 %vm220_vm0, %v1813_v35 }
 0x4d5   :  { %v1307_v45 = vpop.f32.mrf.mxu2 }
 0x4d6   :  { %v1336_v15 = vpop.f32.mrf.mxu3  ;;  %v1308_v29 = vadd.f32 %v1307_v45, %v2396_v2 }
 0x4d7   :  { %v1337_v10 = vadd.f32 %v1336_v15, %v2396_v2 }
 0x4d8   :  { %1790 = vtanh.f32 %v1308_v29 }
 0x4d9   :  { %1792 = vtanh.f32 %v1337_v10 }
 0x4dd   :  { %v1310_v46 = vpop.f32.mrf.mxu2 }
 0x4de   :  { %v1339_v55 = vpop.f32.mrf.mxu3  ;;  %v1311_v54 = vadd.f32 %v1310_v46, %v2398_v63  ;;  %v1791_v40 = vpop.eup %1790 }
 0x4df   :  { %v1340_v41 = vadd.f32 %v1339_v55, %v2398_v63  ;;  %v1793_v61 = vpop.eup %1792  ;;  %v1356_v62 = vmul.f32 %v1791_v40, %v2659_v39 }
 0x4e0   :  { %1794 = vtanh.f32 %v1311_v54  ;;  %v1357_v5 = vmul.f32 %v1793_v61, %v2659_v39 }
 0x4e1   :  { %1796 = vtanh.f32 %v1340_v41 }
 0x4e5   :  { %v1313_v13 = vpop.f32.mrf.mxu2 }
 0x4e6   :  { %v1342_v6 = vpop.f32.mrf.mxu3  ;;  %v1314_v23 = vadd.f32 %v1313_v13, %v2401_v38  ;;  %v1795_v2 = vpop.eup %1794 }
 0x4e7   :  { %v1343_v37 = vadd.f32 %v1342_v6, %v2401_v38  ;;  %v1797_v63 = vpop.eup %1796  ;;  %v1358_v21 = vmul.f32 %v1795_v2, %v2658_v20 }
 0x4e8   :  { %1798 = vtanh.f32 %v1314_v23  ;;  %v1359_v38 = vmul.f32 %v1797_v63, %v2658_v20 }
 0x4e9   :  { %1800 = vtanh.f32 %v1343_v37  ;;  %v1364_v3 = vadd.f32 %v1358_v21, %v1356_v62 }
 0x4ea   :  { %v1373_v49 = vadd.f32 %v1359_v38, %v1357_v5 }
 0x4ed   :  { %v1316_v9 = vpop.f32.mrf.mxu2 }
 0x4ee   :  { %v1345_v19 = vpop.f32.mrf.mxu3  ;;  %v1317_v42 = vadd.f32 %v1316_v9, %v2410_v1  ;;  %v1799_v60 = vpop.eup %1798 }
 0x4ef   :  { %v1346_v50 = vadd.f32 %v1345_v19, %v2410_v1  ;;  %v1801_v0 = vpop.eup %1800  ;;  %v1360_v59 = vmul.f32 %v1799_v60, %v2660_v58 }
 0x4f0   :  { %1802 = vtanh.f32 %v1317_v42  ;;  %v1361_v28 = vmul.f32 %v1801_v0, %v2660_v58 }
 0x4f1   :  { %1804 = vtanh.f32 %v1346_v50  ;;  %v1365_v47 = vadd.f32 %v1364_v3, %v1360_v59 }
 0x4f2   :  { %v1374_v30 = vadd.f32 %v1373_v49, %v1361_v28 }
 0x4f6   :  { %v1803_v36 = vpop.eup %1802 }
 0x4f7   :  { %v1805_v1 = vpop.eup %1804  ;;  %v1362_v51 = vmul.f32 %v1803_v36, %v2424_v7 }
 0x4f8   :  { %v1363_v57 = vmul.f32 %v1805_v1, %v2424_v7 }
 0x4f9   :  { %v1366_v25 = vadd.f32 %v1365_v47, %v1362_v51 }
 0x4fa   :  { %v1375_v20 = vadd.f32 %v1374_v30, %v1363_v57 }
 0x4fb   :  { %v1367_v26 = vrot.slane %v1366_v25, 4 }
 0x4fc   :  { %v1376_v17 = vrot.slane %v1375_v20, 4 }
 0x4fd   :  { %v1368_v4 = vadd.f32 %v1367_v26, %v1366_v25 }
 0x4fe   :  { %v1377_v32 = vadd.f32 %v1376_v17, %v1375_v20 }
 0x4ff   :  { %v1369_v34 = vrot.slane %v1368_v4, 2 }
 0x500   :  { %v1378_v39 = vrot.slane %v1377_v32, 2 }
 0x501   :  { %v1370_v33 = vadd.f32 %v1369_v34, %v1368_v4 }
 0x502   :  { %v1379_v58 = vadd.f32 %v1378_v39, %v1377_v32 }
 0x503   :  { %v1371_v48 = vrot.slane %v1370_v33, 1 }
 0x504   :  { %v1380_v14 = vrot.slane %v1379_v58, 1 }
 0x505   :  { %v1372_v18 = vadd.f32 %v1371_v48, %v1370_v33 }
 0x506   :  { %v1381_v52 = vadd.f32 %v1380_v14, %v1379_v58 }
 0x507   :  { %v1382_v7 = vadd.f32 %v1372_v18, %v2428_v43 }
 0x508   :  { %v1383_v44 = vadd.f32 %v1381_v52, %v2428_v43 }
 0x50a   :  { %v1386_v31 = vrot.slane %v1383_v44, 7 }
 0x50c   :  { %v1387_v16 = vsel %vm510_vm1, %v1382_v7, %v1386_v31 }
 0x50d   :  { %1390 = vst.msk [vmem:[#allocation5 + $0x6] sm:$0x3] %vm2432_vm2, %v1387_v16 }
 0x50e   :  { %1401 = dma.vmem_to_hbm [thread:$0]  %s1397_s10, 128, %s1399_s1, [#allocation4]  }
 0x50f   :  { %1864 = dma.done.wait [#allocation4], 128  }
 0x510   :  { %1865 = vsyncadd [#allocation4], 4294967168 }
 0x511   :  { %1406 = vsyncpa [#allocation3], 1 }
 0x512   :  { %1407 = vsyncpa [#allocation4], 1 }

</bundles_post_ra>
